<compile_context>
chip_gen: v6e
topology: v6e:2x2x1
jax: 0.10.0
libtpu: 0.0.40
codegen_flags: <defaults>
</compile_context>

<pallas_src>
import functools

import numpy as np
import jax
import jax.numpy as jnp
from jax.experimental import pallas as pl
from jax.experimental.pallas import tpu as pltpu

INPUT_SIZE = 2
HIDDEN_SIZE = 4
OUTPUT_SIZE = 1

SUB = 8                      # sublane granule == padded batch
GATES = 4 * HIDDEN_SIZE      # 16 gate lanes, PyTorch order [i, f, g, o]

# Packed-parameter slab row offsets (every section starts on an 8-row granule).
R_WIH0 = 0                                   # INPUT_SIZE rows: W_ih_l0^T
R_B0 = SUB                                   # 1 row: b_ih_l0 + b_hh_l0
R_WHH0 = 2 * SUB                             # H rows, each replicated to 8 sublanes
R_WIH1 = R_WHH0 + SUB * HIDDEN_SIZE          # 48
R_WHH1 = R_WIH1 + SUB * HIDDEN_SIZE          # 80
R_B1 = R_WHH1 + SUB * HIDDEN_SIZE            # 112: (b_ih_l1 + b_hh_l1) x 8 rows
R_WLIN = R_B1 + SUB                          # 120: linear weight (lane-padded) x 8
R_BLIN = R_WLIN + SUB                        # 128: linear bias (broadcast) x 8
R_TOTAL = R_BLIN + SUB                       # 136 rows total


def lstm_kernel(x_ref, p_ref, y_ref, *, seq_len, batch_pad):
    H, I, G, B = HIDDEN_SIZE, INPUT_SIZE, GATES, batch_pad
    SB = seq_len * B

    # ---- Hoisted parameter reads.  All weight rows used in the recurrence are
    # stored pre-replicated across 8 sublanes, so these are plain aligned
    # (8, 16) vreg loads -- no in-kernel broadcasts or relayouts in the loop.
    whh0_b = [p_ref[R_WHH0 + SUB * k:R_WHH0 + SUB * (k + 1), :] for k in range(H)]
    wih1_b = [p_ref[R_WIH1 + SUB * k:R_WIH1 + SUB * (k + 1), :] for k in range(H)]
    whh1_b = [p_ref[R_WHH1 + SUB * k:R_WHH1 + SUB * (k + 1), :] for k in range(H)]
    b1_b = p_ref[R_B1:R_B1 + SUB, :]                 # (8, G)
    wlin_b = p_ref[R_WLIN:R_WLIN + SUB, :][:, 0:H]   # (8, H)
    blin_c = p_ref[R_BLIN:R_BLIN + SUB, :][:, 0:1]   # (8, 1)
    wih0 = p_ref[R_WIH0:R_WIH0 + I, :]               # (I, G)
    b0 = p_ref[R_B0:R_B0 + 1, :]                     # (1, G)

    # ---- Non-recurrent layer-0 input projection for ALL time steps, with the
    # pre-summed bias folded in.  Done as I=2 VPU FMAs (one-time work); the
    # per-step slice xw0[t*8:(t+1)*8] is a full aligned 8-sublane tile.
    x2 = x_ref[...]                                  # (S*B, I)
    xw0 = jnp.broadcast_to(b0, (SB, G))
    for k in range(I):
        w_row = jnp.broadcast_to(wih0[k:k + 1, :], (SB, G))
        xw0 = xw0 + x2[:, k:k + 1] * w_row           # (S*B, G)

    def matvec_fma(init, h, w_rows):
        # h @ W as K=H VPU multiply-adds on one (B, 4H) vreg; w_rows are the
        # pre-replicated (B, 4H) weight rows.  Keeps the MXU off the serial path.
        acc = init
        for k in range(H):
            acc = acc + h[:, k:k + 1] * w_rows[k]
        return acc

    def gates_to_state(gates, c_prev):
        # Full-tile sigmoid + full-tile tanh (2 EUP pushes per cell), then
        # static lane slices in PyTorch gate order [i, f, g, o].
        sg = jax.nn.sigmoid(gates)
        th = jnp.tanh(gates)
        i_g = sg[:, 0:H]
        f_g = sg[:, H:2 * H]
        g_g = th[:, 2 * H:3 * H]
        o_g = sg[:, 3 * H:4 * H]
        c_new = f_g * c_prev + i_g * g_g
        h_new = o_g * jnp.tanh(c_new)
        return h_new, c_new

    zeros = jnp.zeros((B, H), jnp.float32)
    h1, c1, h2, c2 = zeros, zeros, zeros, zeros

    y_cols = []
    for t in range(seq_len):  # static, fully unrolled time loop
        # Layer-1 recurrent half: depends only on the PREVIOUS step's h2, so it
        # is issued ahead of this step's serially-dependent layer-0 work.
        g1 = matvec_fma(b1_b, h2, whh1_b)

        # Layer 0: only the recurrent VPU FMA chain sits on the serial path.
        g0 = matvec_fma(xw0[t * B:(t + 1) * B, :], h1, whh0_b)
        h1, c1 = gates_to_state(g0, c1)

        # Layer-1 input half, now that this step's h1 is available.
        g1 = matvec_fma(g1, h1, wih1_b)
        h2, c2 = gates_to_state(g1, c2)

        # Final Linear (output_size == 1): broadcast multiply + lane reduce.
        # Off the serial chain for every step but the last.
        y_cols.append(jnp.sum(h2 * wlin_b, axis=1, keepdims=True) + blin_c)

    # Single lane-dense 2-D store: (batch_pad, seq) tile.
    y_ref[...] = jnp.concatenate(y_cols, axis=1)


def lstm_forward(x, packed_params):
    S, B, I = x.shape
    assert I == INPUT_SIZE
    assert OUTPUT_SIZE == 1  # in-kernel projection exploits output_size == 1
    B_pad = SUB
    assert B <= B_pad

    # Pad batch to the 8-sublane granule (junk rows compute harmless bounded
    # values and are sliced away); keeps every per-step tile vreg-aligned.
    x_pad = jnp.zeros((S, B_pad, I), jnp.float32).at[:, :B, :].set(x)
    x2d = x_pad.reshape(S * B_pad, I)

    vmem = pl.BlockSpec(memory_space=pltpu.MemorySpace.VMEM)
    out = pl.pallas_call(
        functools.partial(lstm_kernel, seq_len=S, batch_pad=B_pad),
        out_shape=jax.ShapeDtypeStruct((B_pad, S), jnp.float32),
        in_specs=[vmem, vmem],   # exactly two prologue DMAs: x and the slab
        out_specs=vmem,
    )(x2d, packed_params)

    # (B_pad, S) -> (S, B, 1); free XLA-side slice/transpose/reshape.
    return jnp.transpose(out[:B, :])[:, :, None]


def init_params(key):
    """Deterministic init matching PyTorch parameter shapes (uniform +-1/sqrt(H))."""
    H, I, O = HIDDEN_SIZE, INPUT_SIZE, OUTPUT_SIZE
    bound = 1.0 / np.sqrt(H)
    keys = jax.random.split(key, 10)
    u = lambda kk, shape: jax.random.uniform(kk, shape, jnp.float32, -bound, bound)
    return {
        "w_ih_l0": u(keys[0], (4 * H, I)),
        "w_hh_l0": u(keys[1], (4 * H, H)),
        "b_ih_l0": u(keys[2], (4 * H,)),
        "b_hh_l0": u(keys[3], (4 * H,)),
        "w_ih_l1": u(keys[4], (4 * H, H)),
        "w_hh_l1": u(keys[5], (4 * H, H)),
        "b_ih_l1": u(keys[6], (4 * H,)),
        "b_hh_l1": u(keys[7], (4 * H,)),
        "w_lin": u(keys[8], (O, H)),
        "b_lin": u(keys[9], (O,)),
    }


def pack_params(p):
    """Pack all parameters into one (R_TOTAL, 4H) f32 slab.

    Layout: every section 8-row aligned; the recurrent weight rows (W_hh_l0^T,
    W_ih_l1^T, W_hh_l1^T) and b1 / linear params are replicated across 8
    sublanes host-side so the kernel never broadcasts.  Biases are pre-summed
    (b_ih + b_hh).  PyTorch [i, f, g, o] gate column order is preserved.
    """
    H, I = HIDDEN_SIZE, INPUT_SIZE
    wih0 = np.asarray(p["w_ih_l0"]).T            # (I, 4H)
    whh0 = np.asarray(p["w_hh_l0"]).T            # (H, 4H)
    wih1 = np.asarray(p["w_ih_l1"]).T            # (H, 4H)
    whh1 = np.asarray(p["w_hh_l1"]).T            # (H, 4H)
    b0 = np.asarray(p["b_ih_l0"]) + np.asarray(p["b_hh_l0"])   # (4H,)
    b1 = np.asarray(p["b_ih_l1"]) + np.asarray(p["b_hh_l1"])   # (4H,)
    wlin = np.asarray(p["w_lin"])                # (O, H)
    blin = np.asarray(p["b_lin"])                # (O,)

    slab = np.zeros((R_TOTAL, GATES), np.float32)
    slab[R_WIH0:R_WIH0 + I, :] = wih0
    slab[R_B0, :] = b0
    for k in range(H):
        slab[R_WHH0 + SUB * k:R_WHH0 + SUB * (k + 1), :] = whh0[k]
        slab[R_WIH1 + SUB * k:R_WIH1 + SUB * (k + 1), :] = wih1[k]
        slab[R_WHH1 + SUB * k:R_WHH1 + SUB * (k + 1), :] = whh1[k]
    slab[R_B1:R_B1 + SUB, :] = b1
    slab[R_WLIN:R_WLIN + SUB, :H] = wlin[0]
    slab[R_BLIN:R_BLIN + SUB, :] = blin[0]
    return jnp.asarray(slab)


def ref_forward(x, p):
    """Pure-JAX reference with PyTorch LSTM + Linear semantics."""
    H = p["w_hh_l0"].shape[1]
    B = x.shape[1]

    def cell(inp, h, c, w_ih, w_hh, b_ih, b_hh):
        gates = inp @ w_ih.T + h @ w_hh.T + b_ih + b_hh
        i, f, g, o = jnp.split(gates, 4, axis=-1)
        c = jax.nn.sigmoid(f) * c + jax.nn.sigmoid(i) * jnp.tanh(g)
        h = jax.nn.sigmoid(o) * jnp.tanh(c)
        return h, c

    def step(carry, x_t):
        h1, c1, h2, c2 = carry
        h1, c1 = cell(x_t, h1, c1, p["w_ih_l0"], p["w_hh_l0"],
                      p["b_ih_l0"], p["b_hh_l0"])
        h2, c2 = cell(h1, h2, c2, p["w_ih_l1"], p["w_hh_l1"],
                      p["b_ih_l1"], p["b_hh_l1"])
        y = h2 @ p["w_lin"].T + p["b_lin"]
        return (h1, c1, h2, c2), y

    z = jnp.zeros((B, H), jnp.float32)
    _, ys = jax.lax.scan(step, (z, z, z, z), x)
    return ys  # (S, B, O)


if __name__ == "__main__":
    key = jax.random.PRNGKey(0)
    pkey, xkey = jax.random.split(key)
    raw_params = init_params(pkey)
    packed_params = pack_params(raw_params)

    S, B = 8, 2  # seq=8, batch=2, input_size=2 (module defaults)
    x = jax.random.normal(xkey, (S, B, INPUT_SIZE), jnp.float32)

    y = lstm_forward(x, packed_params)
    y = jax.block_until_ready(y)
    assert y.shape == (S, B, OUTPUT_SIZE)

    y_ref = ref_forward(x, raw_params)
    np.testing.assert_allclose(np.asarray(y), np.asarray(y_ref),
                               rtol=1e-5, atol=1e-5)
    print("KERNEL_OK")
</pallas_src>

<mosaic_0001>
module attributes {stable_mosaic.version = 11 : i64} {
  func.func @lstm_kernel(%arg0: memref<64x2xf32, #tpu.memory_space<vmem>>, %arg1: memref<136x16xf32, #tpu.memory_space<vmem>>, %arg2: memref<8x8xf32, #tpu.memory_space<vmem>>) attributes {dimension_semantics = [], scalar_prefetch = 0 : i64, scratch_operands = 0 : i64, tpu.core_type = #tpu.core_type<tc>} {
    %c16 = arith.constant 16 : index
    %c0 = arith.constant 0 : index
    %0 = vector.load %arg1[%c16, %c0] : memref<136x16xf32, #tpu.memory_space<vmem>>, vector<8x16xf32>
    %c24 = arith.constant 24 : index
    %c0_0 = arith.constant 0 : index
    %1 = vector.load %arg1[%c24, %c0_0] : memref<136x16xf32, #tpu.memory_space<vmem>>, vector<8x16xf32>
    %c32 = arith.constant 32 : index
    %c0_1 = arith.constant 0 : index
    %2 = vector.load %arg1[%c32, %c0_1] : memref<136x16xf32, #tpu.memory_space<vmem>>, vector<8x16xf32>
    %c40 = arith.constant 40 : index
    %c0_2 = arith.constant 0 : index
    %3 = vector.load %arg1[%c40, %c0_2] : memref<136x16xf32, #tpu.memory_space<vmem>>, vector<8x16xf32>
    %c48 = arith.constant 48 : index
    %c0_3 = arith.constant 0 : index
    %4 = vector.load %arg1[%c48, %c0_3] : memref<136x16xf32, #tpu.memory_space<vmem>>, vector<8x16xf32>
    %c56 = arith.constant 56 : index
    %c0_4 = arith.constant 0 : index
    %5 = vector.load %arg1[%c56, %c0_4] : memref<136x16xf32, #tpu.memory_space<vmem>>, vector<8x16xf32>
    %c64 = arith.constant 64 : index
    %c0_5 = arith.constant 0 : index
    %6 = vector.load %arg1[%c64, %c0_5] : memref<136x16xf32, #tpu.memory_space<vmem>>, vector<8x16xf32>
    %c72 = arith.constant 72 : index
    %c0_6 = arith.constant 0 : index
    %7 = vector.load %arg1[%c72, %c0_6] : memref<136x16xf32, #tpu.memory_space<vmem>>, vector<8x16xf32>
    %c80 = arith.constant 80 : index
    %c0_7 = arith.constant 0 : index
    %8 = vector.load %arg1[%c80, %c0_7] : memref<136x16xf32, #tpu.memory_space<vmem>>, vector<8x16xf32>
    %c88 = arith.constant 88 : index
    %c0_8 = arith.constant 0 : index
    %9 = vector.load %arg1[%c88, %c0_8] : memref<136x16xf32, #tpu.memory_space<vmem>>, vector<8x16xf32>
    %c96 = arith.constant 96 : index
    %c0_9 = arith.constant 0 : index
    %10 = vector.load %arg1[%c96, %c0_9] : memref<136x16xf32, #tpu.memory_space<vmem>>, vector<8x16xf32>
    %c104 = arith.constant 104 : index
    %c0_10 = arith.constant 0 : index
    %11 = vector.load %arg1[%c104, %c0_10] : memref<136x16xf32, #tpu.memory_space<vmem>>, vector<8x16xf32>
    %c112 = arith.constant 112 : index
    %c0_11 = arith.constant 0 : index
    %12 = vector.load %arg1[%c112, %c0_11] : memref<136x16xf32, #tpu.memory_space<vmem>>, vector<8x16xf32>
    %c120 = arith.constant 120 : index
    %c0_12 = arith.constant 0 : index
    %13 = vector.load %arg1[%c120, %c0_12] : memref<136x16xf32, #tpu.memory_space<vmem>>, vector<8x16xf32>
    %14 = vector.extract_strided_slice %13 {offsets = [0, 0], sizes = [8, 4], strides = [1, 1]} : vector<8x16xf32> to vector<8x4xf32>
    %c128 = arith.constant 128 : index
    %c0_13 = arith.constant 0 : index
    %15 = vector.load %arg1[%c128, %c0_13] : memref<136x16xf32, #tpu.memory_space<vmem>>, vector<8x16xf32>
    %16 = vector.extract_strided_slice %15 {offsets = [0, 0], sizes = [8, 1], strides = [1, 1]} : vector<8x16xf32> to vector<8x1xf32>
    %c0_14 = arith.constant 0 : index
    %c0_15 = arith.constant 0 : index
    %17 = vector.load %arg1[%c0_14, %c0_15] : memref<136x16xf32, #tpu.memory_space<vmem>>, vector<2x16xf32>
    %c8 = arith.constant 8 : index
    %c0_16 = arith.constant 0 : index
    %18 = vector.load %arg1[%c8, %c0_16] : memref<136x16xf32, #tpu.memory_space<vmem>>, vector<1x16xf32>
    %c0_17 = arith.constant 0 : index
    %c0_18 = arith.constant 0 : index
    %19 = vector.load %arg0[%c0_17, %c0_18] : memref<64x2xf32, #tpu.memory_space<vmem>>, vector<64x2xf32>
    %20 = vector.shape_cast %18 : vector<1x16xf32> to vector<1x16xf32>
    %21 = vector.broadcast %20 : vector<1x16xf32> to vector<64x16xf32>
    %22 = vector.extract_strided_slice %17 {offsets = [0, 0], sizes = [1, 16], strides = [1, 1]} : vector<2x16xf32> to vector<1x16xf32>
    %23 = vector.shape_cast %22 : vector<1x16xf32> to vector<1x16xf32>
    %24 = vector.broadcast %23 : vector<1x16xf32> to vector<64x16xf32>
    %25 = vector.extract_strided_slice %19 {offsets = [0, 0], sizes = [64, 1], strides = [1, 1]} : vector<64x2xf32> to vector<64x1xf32>
    %26 = vector.broadcast %25 : vector<64x1xf32> to vector<64x16xf32>
    %27 = arith.mulf %26, %24 : vector<64x16xf32>
    %28 = arith.addf %21, %27 : vector<64x16xf32>
    %29 = vector.extract_strided_slice %17 {offsets = [1, 0], sizes = [1, 16], strides = [1, 1]} : vector<2x16xf32> to vector<1x16xf32>
    %30 = vector.shape_cast %29 : vector<1x16xf32> to vector<1x16xf32>
    %31 = vector.broadcast %30 : vector<1x16xf32> to vector<64x16xf32>
    %32 = vector.extract_strided_slice %19 {offsets = [0, 1], sizes = [64, 1], strides = [1, 1]} : vector<64x2xf32> to vector<64x1xf32>
    %33 = vector.broadcast %32 : vector<64x1xf32> to vector<64x16xf32>
    %34 = arith.mulf %33, %31 : vector<64x16xf32>
    %35 = arith.addf %28, %34 : vector<64x16xf32>
    %cst = arith.constant 0.000000e+00 : f32
    %36 = vector.broadcast %cst : f32 to vector<8x4xf32>
    %37 = vector.extract_strided_slice %36 {offsets = [0, 0], sizes = [8, 1], strides = [1, 1]} : vector<8x4xf32> to vector<8x1xf32>
    %38 = vector.broadcast %37 : vector<8x1xf32> to vector<8x16xf32>
    %39 = arith.mulf %38, %8 : vector<8x16xf32>
    %40 = arith.addf %12, %39 : vector<8x16xf32>
    %41 = vector.extract_strided_slice %36 {offsets = [0, 1], sizes = [8, 1], strides = [1, 1]} : vector<8x4xf32> to vector<8x1xf32>
    %42 = vector.broadcast %41 : vector<8x1xf32> to vector<8x16xf32>
    %43 = arith.mulf %42, %9 : vector<8x16xf32>
    %44 = arith.addf %40, %43 : vector<8x16xf32>
    %45 = vector.extract_strided_slice %36 {offsets = [0, 2], sizes = [8, 1], strides = [1, 1]} : vector<8x4xf32> to vector<8x1xf32>
    %46 = vector.broadcast %45 : vector<8x1xf32> to vector<8x16xf32>
    %47 = arith.mulf %46, %10 : vector<8x16xf32>
    %48 = arith.addf %44, %47 : vector<8x16xf32>
    %49 = vector.extract_strided_slice %36 {offsets = [0, 3], sizes = [8, 1], strides = [1, 1]} : vector<8x4xf32> to vector<8x1xf32>
    %50 = vector.broadcast %49 : vector<8x1xf32> to vector<8x16xf32>
    %51 = arith.mulf %50, %11 : vector<8x16xf32>
    %52 = arith.addf %48, %51 : vector<8x16xf32>
    %53 = vector.extract_strided_slice %35 {offsets = [0, 0], sizes = [8, 16], strides = [1, 1]} : vector<64x16xf32> to vector<8x16xf32>
    %54 = vector.extract_strided_slice %36 {offsets = [0, 0], sizes = [8, 1], strides = [1, 1]} : vector<8x4xf32> to vector<8x1xf32>
    %55 = vector.broadcast %54 : vector<8x1xf32> to vector<8x16xf32>
    %56 = arith.mulf %55, %0 : vector<8x16xf32>
    %57 = arith.addf %53, %56 : vector<8x16xf32>
    %58 = vector.extract_strided_slice %36 {offsets = [0, 1], sizes = [8, 1], strides = [1, 1]} : vector<8x4xf32> to vector<8x1xf32>
    %59 = vector.broadcast %58 : vector<8x1xf32> to vector<8x16xf32>
    %60 = arith.mulf %59, %1 : vector<8x16xf32>
    %61 = arith.addf %57, %60 : vector<8x16xf32>
    %62 = vector.extract_strided_slice %36 {offsets = [0, 2], sizes = [8, 1], strides = [1, 1]} : vector<8x4xf32> to vector<8x1xf32>
    %63 = vector.broadcast %62 : vector<8x1xf32> to vector<8x16xf32>
    %64 = arith.mulf %63, %2 : vector<8x16xf32>
    %65 = arith.addf %61, %64 : vector<8x16xf32>
    %66 = vector.extract_strided_slice %36 {offsets = [0, 3], sizes = [8, 1], strides = [1, 1]} : vector<8x4xf32> to vector<8x1xf32>
    %67 = vector.broadcast %66 : vector<8x1xf32> to vector<8x16xf32>
    %68 = arith.mulf %67, %3 : vector<8x16xf32>
    %69 = arith.addf %65, %68 : vector<8x16xf32>
    %70 = arith.negf %69 : vector<8x16xf32>
    %71 = math.exp %70 : vector<8x16xf32>
    %cst_19 = arith.constant 1.000000e+00 : f32
    %72 = vector.broadcast %cst_19 : f32 to vector<8x16xf32>
    %73 = arith.addf %72, %71 : vector<8x16xf32>
    %74 = arith.divf %72, %73 : vector<8x16xf32>
    %75 = math.tanh %69 : vector<8x16xf32>
    %76 = vector.extract_strided_slice %74 {offsets = [0, 0], sizes = [8, 4], strides = [1, 1]} : vector<8x16xf32> to vector<8x4xf32>
    %77 = vector.extract_strided_slice %74 {offsets = [0, 4], sizes = [8, 4], strides = [1, 1]} : vector<8x16xf32> to vector<8x4xf32>
    %78 = vector.extract_strided_slice %75 {offsets = [0, 8], sizes = [8, 4], strides = [1, 1]} : vector<8x16xf32> to vector<8x4xf32>
    %79 = vector.extract_strided_slice %74 {offsets = [0, 12], sizes = [8, 4], strides = [1, 1]} : vector<8x16xf32> to vector<8x4xf32>
    %80 = arith.mulf %77, %36 : vector<8x4xf32>
    %81 = arith.mulf %76, %78 : vector<8x4xf32>
    %82 = arith.addf %80, %81 : vector<8x4xf32>
    %83 = math.tanh %82 : vector<8x4xf32>
    %84 = arith.mulf %79, %83 : vector<8x4xf32>
    %85 = vector.extract_strided_slice %84 {offsets = [0, 0], sizes = [8, 1], strides = [1, 1]} : vector<8x4xf32> to vector<8x1xf32>
    %86 = vector.broadcast %85 : vector<8x1xf32> to vector<8x16xf32>
    %87 = arith.mulf %86, %4 : vector<8x16xf32>
    %88 = arith.addf %52, %87 : vector<8x16xf32>
    %89 = vector.extract_strided_slice %84 {offsets = [0, 1], sizes = [8, 1], strides = [1, 1]} : vector<8x4xf32> to vector<8x1xf32>
    %90 = vector.broadcast %89 : vector<8x1xf32> to vector<8x16xf32>
    %91 = arith.mulf %90, %5 : vector<8x16xf32>
    %92 = arith.addf %88, %91 : vector<8x16xf32>
    %93 = vector.extract_strided_slice %84 {offsets = [0, 2], sizes = [8, 1], strides = [1, 1]} : vector<8x4xf32> to vector<8x1xf32>
    %94 = vector.broadcast %93 : vector<8x1xf32> to vector<8x16xf32>
    %95 = arith.mulf %94, %6 : vector<8x16xf32>
    %96 = arith.addf %92, %95 : vector<8x16xf32>
    %97 = vector.extract_strided_slice %84 {offsets = [0, 3], sizes = [8, 1], strides = [1, 1]} : vector<8x4xf32> to vector<8x1xf32>
    %98 = vector.broadcast %97 : vector<8x1xf32> to vector<8x16xf32>
    %99 = arith.mulf %98, %7 : vector<8x16xf32>
    %100 = arith.addf %96, %99 : vector<8x16xf32>
    %101 = arith.negf %100 : vector<8x16xf32>
    %102 = math.exp %101 : vector<8x16xf32>
    %cst_20 = arith.constant 1.000000e+00 : f32
    %103 = vector.broadcast %cst_20 : f32 to vector<8x16xf32>
    %104 = arith.addf %103, %102 : vector<8x16xf32>
    %105 = arith.divf %103, %104 : vector<8x16xf32>
    %106 = math.tanh %100 : vector<8x16xf32>
    %107 = vector.extract_strided_slice %105 {offsets = [0, 0], sizes = [8, 4], strides = [1, 1]} : vector<8x16xf32> to vector<8x4xf32>
    %108 = vector.extract_strided_slice %105 {offsets = [0, 4], sizes = [8, 4], strides = [1, 1]} : vector<8x16xf32> to vector<8x4xf32>
    %109 = vector.extract_strided_slice %106 {offsets = [0, 8], sizes = [8, 4], strides = [1, 1]} : vector<8x16xf32> to vector<8x4xf32>
    %110 = vector.extract_strided_slice %105 {offsets = [0, 12], sizes = [8, 4], strides = [1, 1]} : vector<8x16xf32> to vector<8x4xf32>
    %111 = arith.mulf %108, %36 : vector<8x4xf32>
    %112 = arith.mulf %107, %109 : vector<8x4xf32>
    %113 = arith.addf %111, %112 : vector<8x4xf32>
    %114 = math.tanh %113 : vector<8x4xf32>
    %115 = arith.mulf %110, %114 : vector<8x4xf32>
    %116 = arith.mulf %115, %14 : vector<8x4xf32>
    %cst_21 = arith.constant dense<0.000000e+00> : vector<8xf32>
    %117 = vector.multi_reduction <add>, %116, %cst_21 [1] : vector<8x4xf32> to vector<8xf32>
    %118 = vector.shape_cast %117 : vector<8xf32> to vector<8x1xf32>
    %119 = arith.addf %118, %16 : vector<8x1xf32>
    %120 = vector.extract_strided_slice %115 {offsets = [0, 0], sizes = [8, 1], strides = [1, 1]} : vector<8x4xf32> to vector<8x1xf32>
    %121 = vector.broadcast %120 : vector<8x1xf32> to vector<8x16xf32>
    %122 = arith.mulf %121, %8 : vector<8x16xf32>
    %123 = arith.addf %12, %122 : vector<8x16xf32>
    %124 = vector.extract_strided_slice %115 {offsets = [0, 1], sizes = [8, 1], strides = [1, 1]} : vector<8x4xf32> to vector<8x1xf32>
    %125 = vector.broadcast %124 : vector<8x1xf32> to vector<8x16xf32>
    %126 = arith.mulf %125, %9 : vector<8x16xf32>
    %127 = arith.addf %123, %126 : vector<8x16xf32>
    %128 = vector.extract_strided_slice %115 {offsets = [0, 2], sizes = [8, 1], strides = [1, 1]} : vector<8x4xf32> to vector<8x1xf32>
    %129 = vector.broadcast %128 : vector<8x1xf32> to vector<8x16xf32>
    %130 = arith.mulf %129, %10 : vector<8x16xf32>
    %131 = arith.addf %127, %130 : vector<8x16xf32>
    %132 = vector.extract_strided_slice %115 {offsets = [0, 3], sizes = [8, 1], strides = [1, 1]} : vector<8x4xf32> to vector<8x1xf32>
    %133 = vector.broadcast %132 : vector<8x1xf32> to vector<8x16xf32>
    %134 = arith.mulf %133, %11 : vector<8x16xf32>
    %135 = arith.addf %131, %134 : vector<8x16xf32>
    %136 = vector.extract_strided_slice %35 {offsets = [8, 0], sizes = [8, 16], strides = [1, 1]} : vector<64x16xf32> to vector<8x16xf32>
    %137 = vector.extract_strided_slice %84 {offsets = [0, 0], sizes = [8, 1], strides = [1, 1]} : vector<8x4xf32> to vector<8x1xf32>
    %138 = vector.broadcast %137 : vector<8x1xf32> to vector<8x16xf32>
    %139 = arith.mulf %138, %0 : vector<8x16xf32>
    %140 = arith.addf %136, %139 : vector<8x16xf32>
    %141 = vector.extract_strided_slice %84 {offsets = [0, 1], sizes = [8, 1], strides = [1, 1]} : vector<8x4xf32> to vector<8x1xf32>
    %142 = vector.broadcast %141 : vector<8x1xf32> to vector<8x16xf32>
    %143 = arith.mulf %142, %1 : vector<8x16xf32>
    %144 = arith.addf %140, %143 : vector<8x16xf32>
    %145 = vector.extract_strided_slice %84 {offsets = [0, 2], sizes = [8, 1], strides = [1, 1]} : vector<8x4xf32> to vector<8x1xf32>
    %146 = vector.broadcast %145 : vector<8x1xf32> to vector<8x16xf32>
    %147 = arith.mulf %146, %2 : vector<8x16xf32>
    %148 = arith.addf %144, %147 : vector<8x16xf32>
    %149 = vector.extract_strided_slice %84 {offsets = [0, 3], sizes = [8, 1], strides = [1, 1]} : vector<8x4xf32> to vector<8x1xf32>
    %150 = vector.broadcast %149 : vector<8x1xf32> to vector<8x16xf32>
    %151 = arith.mulf %150, %3 : vector<8x16xf32>
    %152 = arith.addf %148, %151 : vector<8x16xf32>
    %153 = arith.negf %152 : vector<8x16xf32>
    %154 = math.exp %153 : vector<8x16xf32>
    %cst_22 = arith.constant 1.000000e+00 : f32
    %155 = vector.broadcast %cst_22 : f32 to vector<8x16xf32>
    %156 = arith.addf %155, %154 : vector<8x16xf32>
    %157 = arith.divf %155, %156 : vector<8x16xf32>
    %158 = math.tanh %152 : vector<8x16xf32>
    %159 = vector.extract_strided_slice %157 {offsets = [0, 0], sizes = [8, 4], strides = [1, 1]} : vector<8x16xf32> to vector<8x4xf32>
    %160 = vector.extract_strided_slice %157 {offsets = [0, 4], sizes = [8, 4], strides = [1, 1]} : vector<8x16xf32> to vector<8x4xf32>
    %161 = vector.extract_strided_slice %158 {offsets = [0, 8], sizes = [8, 4], strides = [1, 1]} : vector<8x16xf32> to vector<8x4xf32>
    %162 = vector.extract_strided_slice %157 {offsets = [0, 12], sizes = [8, 4], strides = [1, 1]} : vector<8x16xf32> to vector<8x4xf32>
    %163 = arith.mulf %160, %82 : vector<8x4xf32>
    %164 = arith.mulf %159, %161 : vector<8x4xf32>
    %165 = arith.addf %163, %164 : vector<8x4xf32>
    %166 = math.tanh %165 : vector<8x4xf32>
    %167 = arith.mulf %162, %166 : vector<8x4xf32>
    %168 = vector.extract_strided_slice %167 {offsets = [0, 0], sizes = [8, 1], strides = [1, 1]} : vector<8x4xf32> to vector<8x1xf32>
    %169 = vector.broadcast %168 : vector<8x1xf32> to vector<8x16xf32>
    %170 = arith.mulf %169, %4 : vector<8x16xf32>
    %171 = arith.addf %135, %170 : vector<8x16xf32>
    %172 = vector.extract_strided_slice %167 {offsets = [0, 1], sizes = [8, 1], strides = [1, 1]} : vector<8x4xf32> to vector<8x1xf32>
    %173 = vector.broadcast %172 : vector<8x1xf32> to vector<8x16xf32>
    %174 = arith.mulf %173, %5 : vector<8x16xf32>
    %175 = arith.addf %171, %174 : vector<8x16xf32>
    %176 = vector.extract_strided_slice %167 {offsets = [0, 2], sizes = [8, 1], strides = [1, 1]} : vector<8x4xf32> to vector<8x1xf32>
    %177 = vector.broadcast %176 : vector<8x1xf32> to vector<8x16xf32>
    %178 = arith.mulf %177, %6 : vector<8x16xf32>
    %179 = arith.addf %175, %178 : vector<8x16xf32>
    %180 = vector.extract_strided_slice %167 {offsets = [0, 3], sizes = [8, 1], strides = [1, 1]} : vector<8x4xf32> to vector<8x1xf32>
    %181 = vector.broadcast %180 : vector<8x1xf32> to vector<8x16xf32>
    %182 = arith.mulf %181, %7 : vector<8x16xf32>
    %183 = arith.addf %179, %182 : vector<8x16xf32>
    %184 = arith.negf %183 : vector<8x16xf32>
    %185 = math.exp %184 : vector<8x16xf32>
    %cst_23 = arith.constant 1.000000e+00 : f32
    %186 = vector.broadcast %cst_23 : f32 to vector<8x16xf32>
    %187 = arith.addf %186, %185 : vector<8x16xf32>
    %188 = arith.divf %186, %187 : vector<8x16xf32>
    %189 = math.tanh %183 : vector<8x16xf32>
    %190 = vector.extract_strided_slice %188 {offsets = [0, 0], sizes = [8, 4], strides = [1, 1]} : vector<8x16xf32> to vector<8x4xf32>
    %191 = vector.extract_strided_slice %188 {offsets = [0, 4], sizes = [8, 4], strides = [1, 1]} : vector<8x16xf32> to vector<8x4xf32>
    %192 = vector.extract_strided_slice %189 {offsets = [0, 8], sizes = [8, 4], strides = [1, 1]} : vector<8x16xf32> to vector<8x4xf32>
    %193 = vector.extract_strided_slice %188 {offsets = [0, 12], sizes = [8, 4], strides = [1, 1]} : vector<8x16xf32> to vector<8x4xf32>
    %194 = arith.mulf %191, %113 : vector<8x4xf32>
    %195 = arith.mulf %190, %192 : vector<8x4xf32>
    %196 = arith.addf %194, %195 : vector<8x4xf32>
    %197 = math.tanh %196 : vector<8x4xf32>
    %198 = arith.mulf %193, %197 : vector<8x4xf32>
    %199 = arith.mulf %198, %14 : vector<8x4xf32>
    %cst_24 = arith.constant dense<0.000000e+00> : vector<8xf32>
    %200 = vector.multi_reduction <add>, %199, %cst_24 [1] : vector<8x4xf32> to vector<8xf32>
    %201 = vector.shape_cast %200 : vector<8xf32> to vector<8x1xf32>
    %202 = arith.addf %201, %16 : vector<8x1xf32>
    %203 = vector.extract_strided_slice %198 {offsets = [0, 0], sizes = [8, 1], strides = [1, 1]} : vector<8x4xf32> to vector<8x1xf32>
    %204 = vector.broadcast %203 : vector<8x1xf32> to vector<8x16xf32>
    %205 = arith.mulf %204, %8 : vector<8x16xf32>
    %206 = arith.addf %12, %205 : vector<8x16xf32>
    %207 = vector.extract_strided_slice %198 {offsets = [0, 1], sizes = [8, 1], strides = [1, 1]} : vector<8x4xf32> to vector<8x1xf32>
    %208 = vector.broadcast %207 : vector<8x1xf32> to vector<8x16xf32>
    %209 = arith.mulf %208, %9 : vector<8x16xf32>
    %210 = arith.addf %206, %209 : vector<8x16xf32>
    %211 = vector.extract_strided_slice %198 {offsets = [0, 2], sizes = [8, 1], strides = [1, 1]} : vector<8x4xf32> to vector<8x1xf32>
    %212 = vector.broadcast %211 : vector<8x1xf32> to vector<8x16xf32>
    %213 = arith.mulf %212, %10 : vector<8x16xf32>
    %214 = arith.addf %210, %213 : vector<8x16xf32>
    %215 = vector.extract_strided_slice %198 {offsets = [0, 3], sizes = [8, 1], strides = [1, 1]} : vector<8x4xf32> to vector<8x1xf32>
    %216 = vector.broadcast %215 : vector<8x1xf32> to vector<8x16xf32>
    %217 = arith.mulf %216, %11 : vector<8x16xf32>
    %218 = arith.addf %214, %217 : vector<8x16xf32>
    %219 = vector.extract_strided_slice %35 {offsets = [16, 0], sizes = [8, 16], strides = [1, 1]} : vector<64x16xf32> to vector<8x16xf32>
    %220 = vector.extract_strided_slice %167 {offsets = [0, 0], sizes = [8, 1], strides = [1, 1]} : vector<8x4xf32> to vector<8x1xf32>
    %221 = vector.broadcast %220 : vector<8x1xf32> to vector<8x16xf32>
    %222 = arith.mulf %221, %0 : vector<8x16xf32>
    %223 = arith.addf %219, %222 : vector<8x16xf32>
    %224 = vector.extract_strided_slice %167 {offsets = [0, 1], sizes = [8, 1], strides = [1, 1]} : vector<8x4xf32> to vector<8x1xf32>
    %225 = vector.broadcast %224 : vector<8x1xf32> to vector<8x16xf32>
    %226 = arith.mulf %225, %1 : vector<8x16xf32>
    %227 = arith.addf %223, %226 : vector<8x16xf32>
    %228 = vector.extract_strided_slice %167 {offsets = [0, 2], sizes = [8, 1], strides = [1, 1]} : vector<8x4xf32> to vector<8x1xf32>
    %229 = vector.broadcast %228 : vector<8x1xf32> to vector<8x16xf32>
    %230 = arith.mulf %229, %2 : vector<8x16xf32>
    %231 = arith.addf %227, %230 : vector<8x16xf32>
    %232 = vector.extract_strided_slice %167 {offsets = [0, 3], sizes = [8, 1], strides = [1, 1]} : vector<8x4xf32> to vector<8x1xf32>
    %233 = vector.broadcast %232 : vector<8x1xf32> to vector<8x16xf32>
    %234 = arith.mulf %233, %3 : vector<8x16xf32>
    %235 = arith.addf %231, %234 : vector<8x16xf32>
    %236 = arith.negf %235 : vector<8x16xf32>
    %237 = math.exp %236 : vector<8x16xf32>
    %cst_25 = arith.constant 1.000000e+00 : f32
    %238 = vector.broadcast %cst_25 : f32 to vector<8x16xf32>
    %239 = arith.addf %238, %237 : vector<8x16xf32>
    %240 = arith.divf %238, %239 : vector<8x16xf32>
    %241 = math.tanh %235 : vector<8x16xf32>
    %242 = vector.extract_strided_slice %240 {offsets = [0, 0], sizes = [8, 4], strides = [1, 1]} : vector<8x16xf32> to vector<8x4xf32>
    %243 = vector.extract_strided_slice %240 {offsets = [0, 4], sizes = [8, 4], strides = [1, 1]} : vector<8x16xf32> to vector<8x4xf32>
    %244 = vector.extract_strided_slice %241 {offsets = [0, 8], sizes = [8, 4], strides = [1, 1]} : vector<8x16xf32> to vector<8x4xf32>
    %245 = vector.extract_strided_slice %240 {offsets = [0, 12], sizes = [8, 4], strides = [1, 1]} : vector<8x16xf32> to vector<8x4xf32>
    %246 = arith.mulf %243, %165 : vector<8x4xf32>
    %247 = arith.mulf %242, %244 : vector<8x4xf32>
    %248 = arith.addf %246, %247 : vector<8x4xf32>
    %249 = math.tanh %248 : vector<8x4xf32>
    %250 = arith.mulf %245, %249 : vector<8x4xf32>
    %251 = vector.extract_strided_slice %250 {offsets = [0, 0], sizes = [8, 1], strides = [1, 1]} : vector<8x4xf32> to vector<8x1xf32>
    %252 = vector.broadcast %251 : vector<8x1xf32> to vector<8x16xf32>
    %253 = arith.mulf %252, %4 : vector<8x16xf32>
    %254 = arith.addf %218, %253 : vector<8x16xf32>
    %255 = vector.extract_strided_slice %250 {offsets = [0, 1], sizes = [8, 1], strides = [1, 1]} : vector<8x4xf32> to vector<8x1xf32>
    %256 = vector.broadcast %255 : vector<8x1xf32> to vector<8x16xf32>
    %257 = arith.mulf %256, %5 : vector<8x16xf32>
    %258 = arith.addf %254, %257 : vector<8x16xf32>
    %259 = vector.extract_strided_slice %250 {offsets = [0, 2], sizes = [8, 1], strides = [1, 1]} : vector<8x4xf32> to vector<8x1xf32>
    %260 = vector.broadcast %259 : vector<8x1xf32> to vector<8x16xf32>
    %261 = arith.mulf %260, %6 : vector<8x16xf32>
    %262 = arith.addf %258, %261 : vector<8x16xf32>
    %263 = vector.extract_strided_slice %250 {offsets = [0, 3], sizes = [8, 1], strides = [1, 1]} : vector<8x4xf32> to vector<8x1xf32>
    %264 = vector.broadcast %263 : vector<8x1xf32> to vector<8x16xf32>
    %265 = arith.mulf %264, %7 : vector<8x16xf32>
    %266 = arith.addf %262, %265 : vector<8x16xf32>
    %267 = arith.negf %266 : vector<8x16xf32>
    %268 = math.exp %267 : vector<8x16xf32>
    %cst_26 = arith.constant 1.000000e+00 : f32
    %269 = vector.broadcast %cst_26 : f32 to vector<8x16xf32>
    %270 = arith.addf %269, %268 : vector<8x16xf32>
    %271 = arith.divf %269, %270 : vector<8x16xf32>
    %272 = math.tanh %266 : vector<8x16xf32>
    %273 = vector.extract_strided_slice %271 {offsets = [0, 0], sizes = [8, 4], strides = [1, 1]} : vector<8x16xf32> to vector<8x4xf32>
    %274 = vector.extract_strided_slice %271 {offsets = [0, 4], sizes = [8, 4], strides = [1, 1]} : vector<8x16xf32> to vector<8x4xf32>
    %275 = vector.extract_strided_slice %272 {offsets = [0, 8], sizes = [8, 4], strides = [1, 1]} : vector<8x16xf32> to vector<8x4xf32>
    %276 = vector.extract_strided_slice %271 {offsets = [0, 12], sizes = [8, 4], strides = [1, 1]} : vector<8x16xf32> to vector<8x4xf32>
    %277 = arith.mulf %274, %196 : vector<8x4xf32>
    %278 = arith.mulf %273, %275 : vector<8x4xf32>
    %279 = arith.addf %277, %278 : vector<8x4xf32>
    %280 = math.tanh %279 : vector<8x4xf32>
    %281 = arith.mulf %276, %280 : vector<8x4xf32>
    %282 = arith.mulf %281, %14 : vector<8x4xf32>
    %cst_27 = arith.constant dense<0.000000e+00> : vector<8xf32>
    %283 = vector.multi_reduction <add>, %282, %cst_27 [1] : vector<8x4xf32> to vector<8xf32>
    %284 = vector.shape_cast %283 : vector<8xf32> to vector<8x1xf32>
    %285 = arith.addf %284, %16 : vector<8x1xf32>
    %286 = vector.extract_strided_slice %281 {offsets = [0, 0], sizes = [8, 1], strides = [1, 1]} : vector<8x4xf32> to vector<8x1xf32>
    %287 = vector.broadcast %286 : vector<8x1xf32> to vector<8x16xf32>
    %288 = arith.mulf %287, %8 : vector<8x16xf32>
    %289 = arith.addf %12, %288 : vector<8x16xf32>
    %290 = vector.extract_strided_slice %281 {offsets = [0, 1], sizes = [8, 1], strides = [1, 1]} : vector<8x4xf32> to vector<8x1xf32>
    %291 = vector.broadcast %290 : vector<8x1xf32> to vector<8x16xf32>
    %292 = arith.mulf %291, %9 : vector<8x16xf32>
    %293 = arith.addf %289, %292 : vector<8x16xf32>
    %294 = vector.extract_strided_slice %281 {offsets = [0, 2], sizes = [8, 1], strides = [1, 1]} : vector<8x4xf32> to vector<8x1xf32>
    %295 = vector.broadcast %294 : vector<8x1xf32> to vector<8x16xf32>
    %296 = arith.mulf %295, %10 : vector<8x16xf32>
    %297 = arith.addf %293, %296 : vector<8x16xf32>
    %298 = vector.extract_strided_slice %281 {offsets = [0, 3], sizes = [8, 1], strides = [1, 1]} : vector<8x4xf32> to vector<8x1xf32>
    %299 = vector.broadcast %298 : vector<8x1xf32> to vector<8x16xf32>
    %300 = arith.mulf %299, %11 : vector<8x16xf32>
    %301 = arith.addf %297, %300 : vector<8x16xf32>
    %302 = vector.extract_strided_slice %35 {offsets = [24, 0], sizes = [8, 16], strides = [1, 1]} : vector<64x16xf32> to vector<8x16xf32>
    %303 = vector.extract_strided_slice %250 {offsets = [0, 0], sizes = [8, 1], strides = [1, 1]} : vector<8x4xf32> to vector<8x1xf32>
    %304 = vector.broadcast %303 : vector<8x1xf32> to vector<8x16xf32>
    %305 = arith.mulf %304, %0 : vector<8x16xf32>
    %306 = arith.addf %302, %305 : vector<8x16xf32>
    %307 = vector.extract_strided_slice %250 {offsets = [0, 1], sizes = [8, 1], strides = [1, 1]} : vector<8x4xf32> to vector<8x1xf32>
    %308 = vector.broadcast %307 : vector<8x1xf32> to vector<8x16xf32>
    %309 = arith.mulf %308, %1 : vector<8x16xf32>
    %310 = arith.addf %306, %309 : vector<8x16xf32>
    %311 = vector.extract_strided_slice %250 {offsets = [0, 2], sizes = [8, 1], strides = [1, 1]} : vector<8x4xf32> to vector<8x1xf32>
    %312 = vector.broadcast %311 : vector<8x1xf32> to vector<8x16xf32>
    %313 = arith.mulf %312, %2 : vector<8x16xf32>
    %314 = arith.addf %310, %313 : vector<8x16xf32>
    %315 = vector.extract_strided_slice %250 {offsets = [0, 3], sizes = [8, 1], strides = [1, 1]} : vector<8x4xf32> to vector<8x1xf32>
    %316 = vector.broadcast %315 : vector<8x1xf32> to vector<8x16xf32>
    %317 = arith.mulf %316, %3 : vector<8x16xf32>
    %318 = arith.addf %314, %317 : vector<8x16xf32>
    %319 = arith.negf %318 : vector<8x16xf32>
    %320 = math.exp %319 : vector<8x16xf32>
    %cst_28 = arith.constant 1.000000e+00 : f32
    %321 = vector.broadcast %cst_28 : f32 to vector<8x16xf32>
    %322 = arith.addf %321, %320 : vector<8x16xf32>
    %323 = arith.divf %321, %322 : vector<8x16xf32>
    %324 = math.tanh %318 : vector<8x16xf32>
    %325 = vector.extract_strided_slice %323 {offsets = [0, 0], sizes = [8, 4], strides = [1, 1]} : vector<8x16xf32> to vector<8x4xf32>
    %326 = vector.extract_strided_slice %323 {offsets = [0, 4], sizes = [8, 4], strides = [1, 1]} : vector<8x16xf32> to vector<8x4xf32>
    %327 = vector.extract_strided_slice %324 {offsets = [0, 8], sizes = [8, 4], strides = [1, 1]} : vector<8x16xf32> to vector<8x4xf32>
    %328 = vector.extract_strided_slice %323 {offsets = [0, 12], sizes = [8, 4], strides = [1, 1]} : vector<8x16xf32> to vector<8x4xf32>
    %329 = arith.mulf %326, %248 : vector<8x4xf32>
    %330 = arith.mulf %325, %327 : vector<8x4xf32>
    %331 = arith.addf %329, %330 : vector<8x4xf32>
    %332 = math.tanh %331 : vector<8x4xf32>
    %333 = arith.mulf %328, %332 : vector<8x4xf32>
    %334 = vector.extract_strided_slice %333 {offsets = [0, 0], sizes = [8, 1], strides = [1, 1]} : vector<8x4xf32> to vector<8x1xf32>
    %335 = vector.broadcast %334 : vector<8x1xf32> to vector<8x16xf32>
    %336 = arith.mulf %335, %4 : vector<8x16xf32>
    %337 = arith.addf %301, %336 : vector<8x16xf32>
    %338 = vector.extract_strided_slice %333 {offsets = [0, 1], sizes = [8, 1], strides = [1, 1]} : vector<8x4xf32> to vector<8x1xf32>
    %339 = vector.broadcast %338 : vector<8x1xf32> to vector<8x16xf32>
    %340 = arith.mulf %339, %5 : vector<8x16xf32>
    %341 = arith.addf %337, %340 : vector<8x16xf32>
    %342 = vector.extract_strided_slice %333 {offsets = [0, 2], sizes = [8, 1], strides = [1, 1]} : vector<8x4xf32> to vector<8x1xf32>
    %343 = vector.broadcast %342 : vector<8x1xf32> to vector<8x16xf32>
    %344 = arith.mulf %343, %6 : vector<8x16xf32>
    %345 = arith.addf %341, %344 : vector<8x16xf32>
    %346 = vector.extract_strided_slice %333 {offsets = [0, 3], sizes = [8, 1], strides = [1, 1]} : vector<8x4xf32> to vector<8x1xf32>
    %347 = vector.broadcast %346 : vector<8x1xf32> to vector<8x16xf32>
    %348 = arith.mulf %347, %7 : vector<8x16xf32>
    %349 = arith.addf %345, %348 : vector<8x16xf32>
    %350 = arith.negf %349 : vector<8x16xf32>
    %351 = math.exp %350 : vector<8x16xf32>
    %cst_29 = arith.constant 1.000000e+00 : f32
    %352 = vector.broadcast %cst_29 : f32 to vector<8x16xf32>
    %353 = arith.addf %352, %351 : vector<8x16xf32>
    %354 = arith.divf %352, %353 : vector<8x16xf32>
    %355 = math.tanh %349 : vector<8x16xf32>
    %356 = vector.extract_strided_slice %354 {offsets = [0, 0], sizes = [8, 4], strides = [1, 1]} : vector<8x16xf32> to vector<8x4xf32>
    %357 = vector.extract_strided_slice %354 {offsets = [0, 4], sizes = [8, 4], strides = [1, 1]} : vector<8x16xf32> to vector<8x4xf32>
    %358 = vector.extract_strided_slice %355 {offsets = [0, 8], sizes = [8, 4], strides = [1, 1]} : vector<8x16xf32> to vector<8x4xf32>
    %359 = vector.extract_strided_slice %354 {offsets = [0, 12], sizes = [8, 4], strides = [1, 1]} : vector<8x16xf32> to vector<8x4xf32>
    %360 = arith.mulf %357, %279 : vector<8x4xf32>
    %361 = arith.mulf %356, %358 : vector<8x4xf32>
    %362 = arith.addf %360, %361 : vector<8x4xf32>
    %363 = math.tanh %362 : vector<8x4xf32>
    %364 = arith.mulf %359, %363 : vector<8x4xf32>
    %365 = arith.mulf %364, %14 : vector<8x4xf32>
    %cst_30 = arith.constant dense<0.000000e+00> : vector<8xf32>
    %366 = vector.multi_reduction <add>, %365, %cst_30 [1] : vector<8x4xf32> to vector<8xf32>
    %367 = vector.shape_cast %366 : vector<8xf32> to vector<8x1xf32>
    %368 = arith.addf %367, %16 : vector<8x1xf32>
    %369 = vector.extract_strided_slice %364 {offsets = [0, 0], sizes = [8, 1], strides = [1, 1]} : vector<8x4xf32> to vector<8x1xf32>
    %370 = vector.broadcast %369 : vector<8x1xf32> to vector<8x16xf32>
    %371 = arith.mulf %370, %8 : vector<8x16xf32>
    %372 = arith.addf %12, %371 : vector<8x16xf32>
    %373 = vector.extract_strided_slice %364 {offsets = [0, 1], sizes = [8, 1], strides = [1, 1]} : vector<8x4xf32> to vector<8x1xf32>
    %374 = vector.broadcast %373 : vector<8x1xf32> to vector<8x16xf32>
    %375 = arith.mulf %374, %9 : vector<8x16xf32>
    %376 = arith.addf %372, %375 : vector<8x16xf32>
    %377 = vector.extract_strided_slice %364 {offsets = [0, 2], sizes = [8, 1], strides = [1, 1]} : vector<8x4xf32> to vector<8x1xf32>
    %378 = vector.broadcast %377 : vector<8x1xf32> to vector<8x16xf32>
    %379 = arith.mulf %378, %10 : vector<8x16xf32>
    %380 = arith.addf %376, %379 : vector<8x16xf32>
    %381 = vector.extract_strided_slice %364 {offsets = [0, 3], sizes = [8, 1], strides = [1, 1]} : vector<8x4xf32> to vector<8x1xf32>
    %382 = vector.broadcast %381 : vector<8x1xf32> to vector<8x16xf32>
    %383 = arith.mulf %382, %11 : vector<8x16xf32>
    %384 = arith.addf %380, %383 : vector<8x16xf32>
    %385 = vector.extract_strided_slice %35 {offsets = [32, 0], sizes = [8, 16], strides = [1, 1]} : vector<64x16xf32> to vector<8x16xf32>
    %386 = vector.extract_strided_slice %333 {offsets = [0, 0], sizes = [8, 1], strides = [1, 1]} : vector<8x4xf32> to vector<8x1xf32>
    %387 = vector.broadcast %386 : vector<8x1xf32> to vector<8x16xf32>
    %388 = arith.mulf %387, %0 : vector<8x16xf32>
    %389 = arith.addf %385, %388 : vector<8x16xf32>
    %390 = vector.extract_strided_slice %333 {offsets = [0, 1], sizes = [8, 1], strides = [1, 1]} : vector<8x4xf32> to vector<8x1xf32>
    %391 = vector.broadcast %390 : vector<8x1xf32> to vector<8x16xf32>
    %392 = arith.mulf %391, %1 : vector<8x16xf32>
    %393 = arith.addf %389, %392 : vector<8x16xf32>
    %394 = vector.extract_strided_slice %333 {offsets = [0, 2], sizes = [8, 1], strides = [1, 1]} : vector<8x4xf32> to vector<8x1xf32>
    %395 = vector.broadcast %394 : vector<8x1xf32> to vector<8x16xf32>
    %396 = arith.mulf %395, %2 : vector<8x16xf32>
    %397 = arith.addf %393, %396 : vector<8x16xf32>
    %398 = vector.extract_strided_slice %333 {offsets = [0, 3], sizes = [8, 1], strides = [1, 1]} : vector<8x4xf32> to vector<8x1xf32>
    %399 = vector.broadcast %398 : vector<8x1xf32> to vector<8x16xf32>
    %400 = arith.mulf %399, %3 : vector<8x16xf32>
    %401 = arith.addf %397, %400 : vector<8x16xf32>
    %402 = arith.negf %401 : vector<8x16xf32>
    %403 = math.exp %402 : vector<8x16xf32>
    %cst_31 = arith.constant 1.000000e+00 : f32
    %404 = vector.broadcast %cst_31 : f32 to vector<8x16xf32>
    %405 = arith.addf %404, %403 : vector<8x16xf32>
    %406 = arith.divf %404, %405 : vector<8x16xf32>
    %407 = math.tanh %401 : vector<8x16xf32>
    %408 = vector.extract_strided_slice %406 {offsets = [0, 0], sizes = [8, 4], strides = [1, 1]} : vector<8x16xf32> to vector<8x4xf32>
    %409 = vector.extract_strided_slice %406 {offsets = [0, 4], sizes = [8, 4], strides = [1, 1]} : vector<8x16xf32> to vector<8x4xf32>
    %410 = vector.extract_strided_slice %407 {offsets = [0, 8], sizes = [8, 4], strides = [1, 1]} : vector<8x16xf32> to vector<8x4xf32>
    %411 = vector.extract_strided_slice %406 {offsets = [0, 12], sizes = [8, 4], strides = [1, 1]} : vector<8x16xf32> to vector<8x4xf32>
    %412 = arith.mulf %409, %331 : vector<8x4xf32>
    %413 = arith.mulf %408, %410 : vector<8x4xf32>
    %414 = arith.addf %412, %413 : vector<8x4xf32>
    %415 = math.tanh %414 : vector<8x4xf32>
    %416 = arith.mulf %411, %415 : vector<8x4xf32>
    %417 = vector.extract_strided_slice %416 {offsets = [0, 0], sizes = [8, 1], strides = [1, 1]} : vector<8x4xf32> to vector<8x1xf32>
    %418 = vector.broadcast %417 : vector<8x1xf32> to vector<8x16xf32>
    %419 = arith.mulf %418, %4 : vector<8x16xf32>
    %420 = arith.addf %384, %419 : vector<8x16xf32>
    %421 = vector.extract_strided_slice %416 {offsets = [0, 1], sizes = [8, 1], strides = [1, 1]} : vector<8x4xf32> to vector<8x1xf32>
    %422 = vector.broadcast %421 : vector<8x1xf32> to vector<8x16xf32>
    %423 = arith.mulf %422, %5 : vector<8x16xf32>
    %424 = arith.addf %420, %423 : vector<8x16xf32>
    %425 = vector.extract_strided_slice %416 {offsets = [0, 2], sizes = [8, 1], strides = [1, 1]} : vector<8x4xf32> to vector<8x1xf32>
    %426 = vector.broadcast %425 : vector<8x1xf32> to vector<8x16xf32>
    %427 = arith.mulf %426, %6 : vector<8x16xf32>
    %428 = arith.addf %424, %427 : vector<8x16xf32>
    %429 = vector.extract_strided_slice %416 {offsets = [0, 3], sizes = [8, 1], strides = [1, 1]} : vector<8x4xf32> to vector<8x1xf32>
    %430 = vector.broadcast %429 : vector<8x1xf32> to vector<8x16xf32>
    %431 = arith.mulf %430, %7 : vector<8x16xf32>
    %432 = arith.addf %428, %431 : vector<8x16xf32>
    %433 = arith.negf %432 : vector<8x16xf32>
    %434 = math.exp %433 : vector<8x16xf32>
    %cst_32 = arith.constant 1.000000e+00 : f32
    %435 = vector.broadcast %cst_32 : f32 to vector<8x16xf32>
    %436 = arith.addf %435, %434 : vector<8x16xf32>
    %437 = arith.divf %435, %436 : vector<8x16xf32>
    %438 = math.tanh %432 : vector<8x16xf32>
    %439 = vector.extract_strided_slice %437 {offsets = [0, 0], sizes = [8, 4], strides = [1, 1]} : vector<8x16xf32> to vector<8x4xf32>
    %440 = vector.extract_strided_slice %437 {offsets = [0, 4], sizes = [8, 4], strides = [1, 1]} : vector<8x16xf32> to vector<8x4xf32>
    %441 = vector.extract_strided_slice %438 {offsets = [0, 8], sizes = [8, 4], strides = [1, 1]} : vector<8x16xf32> to vector<8x4xf32>
    %442 = vector.extract_strided_slice %437 {offsets = [0, 12], sizes = [8, 4], strides = [1, 1]} : vector<8x16xf32> to vector<8x4xf32>
    %443 = arith.mulf %440, %362 : vector<8x4xf32>
    %444 = arith.mulf %439, %441 : vector<8x4xf32>
    %445 = arith.addf %443, %444 : vector<8x4xf32>
    %446 = math.tanh %445 : vector<8x4xf32>
    %447 = arith.mulf %442, %446 : vector<8x4xf32>
    %448 = arith.mulf %447, %14 : vector<8x4xf32>
    %cst_33 = arith.constant dense<0.000000e+00> : vector<8xf32>
    %449 = vector.multi_reduction <add>, %448, %cst_33 [1] : vector<8x4xf32> to vector<8xf32>
    %450 = vector.shape_cast %449 : vector<8xf32> to vector<8x1xf32>
    %451 = arith.addf %450, %16 : vector<8x1xf32>
    %452 = vector.extract_strided_slice %447 {offsets = [0, 0], sizes = [8, 1], strides = [1, 1]} : vector<8x4xf32> to vector<8x1xf32>
    %453 = vector.broadcast %452 : vector<8x1xf32> to vector<8x16xf32>
    %454 = arith.mulf %453, %8 : vector<8x16xf32>
    %455 = arith.addf %12, %454 : vector<8x16xf32>
    %456 = vector.extract_strided_slice %447 {offsets = [0, 1], sizes = [8, 1], strides = [1, 1]} : vector<8x4xf32> to vector<8x1xf32>
    %457 = vector.broadcast %456 : vector<8x1xf32> to vector<8x16xf32>
    %458 = arith.mulf %457, %9 : vector<8x16xf32>
    %459 = arith.addf %455, %458 : vector<8x16xf32>
    %460 = vector.extract_strided_slice %447 {offsets = [0, 2], sizes = [8, 1], strides = [1, 1]} : vector<8x4xf32> to vector<8x1xf32>
    %461 = vector.broadcast %460 : vector<8x1xf32> to vector<8x16xf32>
    %462 = arith.mulf %461, %10 : vector<8x16xf32>
    %463 = arith.addf %459, %462 : vector<8x16xf32>
    %464 = vector.extract_strided_slice %447 {offsets = [0, 3], sizes = [8, 1], strides = [1, 1]} : vector<8x4xf32> to vector<8x1xf32>
    %465 = vector.broadcast %464 : vector<8x1xf32> to vector<8x16xf32>
    %466 = arith.mulf %465, %11 : vector<8x16xf32>
    %467 = arith.addf %463, %466 : vector<8x16xf32>
    %468 = vector.extract_strided_slice %35 {offsets = [40, 0], sizes = [8, 16], strides = [1, 1]} : vector<64x16xf32> to vector<8x16xf32>
    %469 = vector.extract_strided_slice %416 {offsets = [0, 0], sizes = [8, 1], strides = [1, 1]} : vector<8x4xf32> to vector<8x1xf32>
    %470 = vector.broadcast %469 : vector<8x1xf32> to vector<8x16xf32>
    %471 = arith.mulf %470, %0 : vector<8x16xf32>
    %472 = arith.addf %468, %471 : vector<8x16xf32>
    %473 = vector.extract_strided_slice %416 {offsets = [0, 1], sizes = [8, 1], strides = [1, 1]} : vector<8x4xf32> to vector<8x1xf32>
    %474 = vector.broadcast %473 : vector<8x1xf32> to vector<8x16xf32>
    %475 = arith.mulf %474, %1 : vector<8x16xf32>
    %476 = arith.addf %472, %475 : vector<8x16xf32>
    %477 = vector.extract_strided_slice %416 {offsets = [0, 2], sizes = [8, 1], strides = [1, 1]} : vector<8x4xf32> to vector<8x1xf32>
    %478 = vector.broadcast %477 : vector<8x1xf32> to vector<8x16xf32>
    %479 = arith.mulf %478, %2 : vector<8x16xf32>
    %480 = arith.addf %476, %479 : vector<8x16xf32>
    %481 = vector.extract_strided_slice %416 {offsets = [0, 3], sizes = [8, 1], strides = [1, 1]} : vector<8x4xf32> to vector<8x1xf32>
    %482 = vector.broadcast %481 : vector<8x1xf32> to vector<8x16xf32>
    %483 = arith.mulf %482, %3 : vector<8x16xf32>
    %484 = arith.addf %480, %483 : vector<8x16xf32>
    %485 = arith.negf %484 : vector<8x16xf32>
    %486 = math.exp %485 : vector<8x16xf32>
    %cst_34 = arith.constant 1.000000e+00 : f32
    %487 = vector.broadcast %cst_34 : f32 to vector<8x16xf32>
    %488 = arith.addf %487, %486 : vector<8x16xf32>
    %489 = arith.divf %487, %488 : vector<8x16xf32>
    %490 = math.tanh %484 : vector<8x16xf32>
    %491 = vector.extract_strided_slice %489 {offsets = [0, 0], sizes = [8, 4], strides = [1, 1]} : vector<8x16xf32> to vector<8x4xf32>
    %492 = vector.extract_strided_slice %489 {offsets = [0, 4], sizes = [8, 4], strides = [1, 1]} : vector<8x16xf32> to vector<8x4xf32>
    %493 = vector.extract_strided_slice %490 {offsets = [0, 8], sizes = [8, 4], strides = [1, 1]} : vector<8x16xf32> to vector<8x4xf32>
    %494 = vector.extract_strided_slice %489 {offsets = [0, 12], sizes = [8, 4], strides = [1, 1]} : vector<8x16xf32> to vector<8x4xf32>
    %495 = arith.mulf %492, %414 : vector<8x4xf32>
    %496 = arith.mulf %491, %493 : vector<8x4xf32>
    %497 = arith.addf %495, %496 : vector<8x4xf32>
    %498 = math.tanh %497 : vector<8x4xf32>
    %499 = arith.mulf %494, %498 : vector<8x4xf32>
    %500 = vector.extract_strided_slice %499 {offsets = [0, 0], sizes = [8, 1], strides = [1, 1]} : vector<8x4xf32> to vector<8x1xf32>
    %501 = vector.broadcast %500 : vector<8x1xf32> to vector<8x16xf32>
    %502 = arith.mulf %501, %4 : vector<8x16xf32>
    %503 = arith.addf %467, %502 : vector<8x16xf32>
    %504 = vector.extract_strided_slice %499 {offsets = [0, 1], sizes = [8, 1], strides = [1, 1]} : vector<8x4xf32> to vector<8x1xf32>
    %505 = vector.broadcast %504 : vector<8x1xf32> to vector<8x16xf32>
    %506 = arith.mulf %505, %5 : vector<8x16xf32>
    %507 = arith.addf %503, %506 : vector<8x16xf32>
    %508 = vector.extract_strided_slice %499 {offsets = [0, 2], sizes = [8, 1], strides = [1, 1]} : vector<8x4xf32> to vector<8x1xf32>
    %509 = vector.broadcast %508 : vector<8x1xf32> to vector<8x16xf32>
    %510 = arith.mulf %509, %6 : vector<8x16xf32>
    %511 = arith.addf %507, %510 : vector<8x16xf32>
    %512 = vector.extract_strided_slice %499 {offsets = [0, 3], sizes = [8, 1], strides = [1, 1]} : vector<8x4xf32> to vector<8x1xf32>
    %513 = vector.broadcast %512 : vector<8x1xf32> to vector<8x16xf32>
    %514 = arith.mulf %513, %7 : vector<8x16xf32>
    %515 = arith.addf %511, %514 : vector<8x16xf32>
    %516 = arith.negf %515 : vector<8x16xf32>
    %517 = math.exp %516 : vector<8x16xf32>
    %cst_35 = arith.constant 1.000000e+00 : f32
    %518 = vector.broadcast %cst_35 : f32 to vector<8x16xf32>
    %519 = arith.addf %518, %517 : vector<8x16xf32>
    %520 = arith.divf %518, %519 : vector<8x16xf32>
    %521 = math.tanh %515 : vector<8x16xf32>
    %522 = vector.extract_strided_slice %520 {offsets = [0, 0], sizes = [8, 4], strides = [1, 1]} : vector<8x16xf32> to vector<8x4xf32>
    %523 = vector.extract_strided_slice %520 {offsets = [0, 4], sizes = [8, 4], strides = [1, 1]} : vector<8x16xf32> to vector<8x4xf32>
    %524 = vector.extract_strided_slice %521 {offsets = [0, 8], sizes = [8, 4], strides = [1, 1]} : vector<8x16xf32> to vector<8x4xf32>
    %525 = vector.extract_strided_slice %520 {offsets = [0, 12], sizes = [8, 4], strides = [1, 1]} : vector<8x16xf32> to vector<8x4xf32>
    %526 = arith.mulf %523, %445 : vector<8x4xf32>
    %527 = arith.mulf %522, %524 : vector<8x4xf32>
    %528 = arith.addf %526, %527 : vector<8x4xf32>
    %529 = math.tanh %528 : vector<8x4xf32>
    %530 = arith.mulf %525, %529 : vector<8x4xf32>
    %531 = arith.mulf %530, %14 : vector<8x4xf32>
    %cst_36 = arith.constant dense<0.000000e+00> : vector<8xf32>
    %532 = vector.multi_reduction <add>, %531, %cst_36 [1] : vector<8x4xf32> to vector<8xf32>
    %533 = vector.shape_cast %532 : vector<8xf32> to vector<8x1xf32>
    %534 = arith.addf %533, %16 : vector<8x1xf32>
    %535 = vector.extract_strided_slice %530 {offsets = [0, 0], sizes = [8, 1], strides = [1, 1]} : vector<8x4xf32> to vector<8x1xf32>
    %536 = vector.broadcast %535 : vector<8x1xf32> to vector<8x16xf32>
    %537 = arith.mulf %536, %8 : vector<8x16xf32>
    %538 = arith.addf %12, %537 : vector<8x16xf32>
    %539 = vector.extract_strided_slice %530 {offsets = [0, 1], sizes = [8, 1], strides = [1, 1]} : vector<8x4xf32> to vector<8x1xf32>
    %540 = vector.broadcast %539 : vector<8x1xf32> to vector<8x16xf32>
    %541 = arith.mulf %540, %9 : vector<8x16xf32>
    %542 = arith.addf %538, %541 : vector<8x16xf32>
    %543 = vector.extract_strided_slice %530 {offsets = [0, 2], sizes = [8, 1], strides = [1, 1]} : vector<8x4xf32> to vector<8x1xf32>
    %544 = vector.broadcast %543 : vector<8x1xf32> to vector<8x16xf32>
    %545 = arith.mulf %544, %10 : vector<8x16xf32>
    %546 = arith.addf %542, %545 : vector<8x16xf32>
    %547 = vector.extract_strided_slice %530 {offsets = [0, 3], sizes = [8, 1], strides = [1, 1]} : vector<8x4xf32> to vector<8x1xf32>
    %548 = vector.broadcast %547 : vector<8x1xf32> to vector<8x16xf32>
    %549 = arith.mulf %548, %11 : vector<8x16xf32>
    %550 = arith.addf %546, %549 : vector<8x16xf32>
    %551 = vector.extract_strided_slice %35 {offsets = [48, 0], sizes = [8, 16], strides = [1, 1]} : vector<64x16xf32> to vector<8x16xf32>
    %552 = vector.extract_strided_slice %499 {offsets = [0, 0], sizes = [8, 1], strides = [1, 1]} : vector<8x4xf32> to vector<8x1xf32>
    %553 = vector.broadcast %552 : vector<8x1xf32> to vector<8x16xf32>
    %554 = arith.mulf %553, %0 : vector<8x16xf32>
    %555 = arith.addf %551, %554 : vector<8x16xf32>
    %556 = vector.extract_strided_slice %499 {offsets = [0, 1], sizes = [8, 1], strides = [1, 1]} : vector<8x4xf32> to vector<8x1xf32>
    %557 = vector.broadcast %556 : vector<8x1xf32> to vector<8x16xf32>
    %558 = arith.mulf %557, %1 : vector<8x16xf32>
    %559 = arith.addf %555, %558 : vector<8x16xf32>
    %560 = vector.extract_strided_slice %499 {offsets = [0, 2], sizes = [8, 1], strides = [1, 1]} : vector<8x4xf32> to vector<8x1xf32>
    %561 = vector.broadcast %560 : vector<8x1xf32> to vector<8x16xf32>
    %562 = arith.mulf %561, %2 : vector<8x16xf32>
    %563 = arith.addf %559, %562 : vector<8x16xf32>
    %564 = vector.extract_strided_slice %499 {offsets = [0, 3], sizes = [8, 1], strides = [1, 1]} : vector<8x4xf32> to vector<8x1xf32>
    %565 = vector.broadcast %564 : vector<8x1xf32> to vector<8x16xf32>
    %566 = arith.mulf %565, %3 : vector<8x16xf32>
    %567 = arith.addf %563, %566 : vector<8x16xf32>
    %568 = arith.negf %567 : vector<8x16xf32>
    %569 = math.exp %568 : vector<8x16xf32>
    %cst_37 = arith.constant 1.000000e+00 : f32
    %570 = vector.broadcast %cst_37 : f32 to vector<8x16xf32>
    %571 = arith.addf %570, %569 : vector<8x16xf32>
    %572 = arith.divf %570, %571 : vector<8x16xf32>
    %573 = math.tanh %567 : vector<8x16xf32>
    %574 = vector.extract_strided_slice %572 {offsets = [0, 0], sizes = [8, 4], strides = [1, 1]} : vector<8x16xf32> to vector<8x4xf32>
    %575 = vector.extract_strided_slice %572 {offsets = [0, 4], sizes = [8, 4], strides = [1, 1]} : vector<8x16xf32> to vector<8x4xf32>
    %576 = vector.extract_strided_slice %573 {offsets = [0, 8], sizes = [8, 4], strides = [1, 1]} : vector<8x16xf32> to vector<8x4xf32>
    %577 = vector.extract_strided_slice %572 {offsets = [0, 12], sizes = [8, 4], strides = [1, 1]} : vector<8x16xf32> to vector<8x4xf32>
    %578 = arith.mulf %575, %497 : vector<8x4xf32>
    %579 = arith.mulf %574, %576 : vector<8x4xf32>
    %580 = arith.addf %578, %579 : vector<8x4xf32>
    %581 = math.tanh %580 : vector<8x4xf32>
    %582 = arith.mulf %577, %581 : vector<8x4xf32>
    %583 = vector.extract_strided_slice %582 {offsets = [0, 0], sizes = [8, 1], strides = [1, 1]} : vector<8x4xf32> to vector<8x1xf32>
    %584 = vector.broadcast %583 : vector<8x1xf32> to vector<8x16xf32>
    %585 = arith.mulf %584, %4 : vector<8x16xf32>
    %586 = arith.addf %550, %585 : vector<8x16xf32>
    %587 = vector.extract_strided_slice %582 {offsets = [0, 1], sizes = [8, 1], strides = [1, 1]} : vector<8x4xf32> to vector<8x1xf32>
    %588 = vector.broadcast %587 : vector<8x1xf32> to vector<8x16xf32>
    %589 = arith.mulf %588, %5 : vector<8x16xf32>
    %590 = arith.addf %586, %589 : vector<8x16xf32>
    %591 = vector.extract_strided_slice %582 {offsets = [0, 2], sizes = [8, 1], strides = [1, 1]} : vector<8x4xf32> to vector<8x1xf32>
    %592 = vector.broadcast %591 : vector<8x1xf32> to vector<8x16xf32>
    %593 = arith.mulf %592, %6 : vector<8x16xf32>
    %594 = arith.addf %590, %593 : vector<8x16xf32>
    %595 = vector.extract_strided_slice %582 {offsets = [0, 3], sizes = [8, 1], strides = [1, 1]} : vector<8x4xf32> to vector<8x1xf32>
    %596 = vector.broadcast %595 : vector<8x1xf32> to vector<8x16xf32>
    %597 = arith.mulf %596, %7 : vector<8x16xf32>
    %598 = arith.addf %594, %597 : vector<8x16xf32>
    %599 = arith.negf %598 : vector<8x16xf32>
    %600 = math.exp %599 : vector<8x16xf32>
    %cst_38 = arith.constant 1.000000e+00 : f32
    %601 = vector.broadcast %cst_38 : f32 to vector<8x16xf32>
    %602 = arith.addf %601, %600 : vector<8x16xf32>
    %603 = arith.divf %601, %602 : vector<8x16xf32>
    %604 = math.tanh %598 : vector<8x16xf32>
    %605 = vector.extract_strided_slice %603 {offsets = [0, 0], sizes = [8, 4], strides = [1, 1]} : vector<8x16xf32> to vector<8x4xf32>
    %606 = vector.extract_strided_slice %603 {offsets = [0, 4], sizes = [8, 4], strides = [1, 1]} : vector<8x16xf32> to vector<8x4xf32>
    %607 = vector.extract_strided_slice %604 {offsets = [0, 8], sizes = [8, 4], strides = [1, 1]} : vector<8x16xf32> to vector<8x4xf32>
    %608 = vector.extract_strided_slice %603 {offsets = [0, 12], sizes = [8, 4], strides = [1, 1]} : vector<8x16xf32> to vector<8x4xf32>
    %609 = arith.mulf %606, %528 : vector<8x4xf32>
    %610 = arith.mulf %605, %607 : vector<8x4xf32>
    %611 = arith.addf %609, %610 : vector<8x4xf32>
    %612 = math.tanh %611 : vector<8x4xf32>
    %613 = arith.mulf %608, %612 : vector<8x4xf32>
    %614 = arith.mulf %613, %14 : vector<8x4xf32>
    %cst_39 = arith.constant dense<0.000000e+00> : vector<8xf32>
    %615 = vector.multi_reduction <add>, %614, %cst_39 [1] : vector<8x4xf32> to vector<8xf32>
    %616 = vector.shape_cast %615 : vector<8xf32> to vector<8x1xf32>
    %617 = arith.addf %616, %16 : vector<8x1xf32>
    %618 = vector.extract_strided_slice %613 {offsets = [0, 0], sizes = [8, 1], strides = [1, 1]} : vector<8x4xf32> to vector<8x1xf32>
    %619 = vector.broadcast %618 : vector<8x1xf32> to vector<8x16xf32>
    %620 = arith.mulf %619, %8 : vector<8x16xf32>
    %621 = arith.addf %12, %620 : vector<8x16xf32>
    %622 = vector.extract_strided_slice %613 {offsets = [0, 1], sizes = [8, 1], strides = [1, 1]} : vector<8x4xf32> to vector<8x1xf32>
    %623 = vector.broadcast %622 : vector<8x1xf32> to vector<8x16xf32>
    %624 = arith.mulf %623, %9 : vector<8x16xf32>
    %625 = arith.addf %621, %624 : vector<8x16xf32>
    %626 = vector.extract_strided_slice %613 {offsets = [0, 2], sizes = [8, 1], strides = [1, 1]} : vector<8x4xf32> to vector<8x1xf32>
    %627 = vector.broadcast %626 : vector<8x1xf32> to vector<8x16xf32>
    %628 = arith.mulf %627, %10 : vector<8x16xf32>
    %629 = arith.addf %625, %628 : vector<8x16xf32>
    %630 = vector.extract_strided_slice %613 {offsets = [0, 3], sizes = [8, 1], strides = [1, 1]} : vector<8x4xf32> to vector<8x1xf32>
    %631 = vector.broadcast %630 : vector<8x1xf32> to vector<8x16xf32>
    %632 = arith.mulf %631, %11 : vector<8x16xf32>
    %633 = arith.addf %629, %632 : vector<8x16xf32>
    %634 = vector.extract_strided_slice %35 {offsets = [56, 0], sizes = [8, 16], strides = [1, 1]} : vector<64x16xf32> to vector<8x16xf32>
    %635 = vector.extract_strided_slice %582 {offsets = [0, 0], sizes = [8, 1], strides = [1, 1]} : vector<8x4xf32> to vector<8x1xf32>
    %636 = vector.broadcast %635 : vector<8x1xf32> to vector<8x16xf32>
    %637 = arith.mulf %636, %0 : vector<8x16xf32>
    %638 = arith.addf %634, %637 : vector<8x16xf32>
    %639 = vector.extract_strided_slice %582 {offsets = [0, 1], sizes = [8, 1], strides = [1, 1]} : vector<8x4xf32> to vector<8x1xf32>
    %640 = vector.broadcast %639 : vector<8x1xf32> to vector<8x16xf32>
    %641 = arith.mulf %640, %1 : vector<8x16xf32>
    %642 = arith.addf %638, %641 : vector<8x16xf32>
    %643 = vector.extract_strided_slice %582 {offsets = [0, 2], sizes = [8, 1], strides = [1, 1]} : vector<8x4xf32> to vector<8x1xf32>
    %644 = vector.broadcast %643 : vector<8x1xf32> to vector<8x16xf32>
    %645 = arith.mulf %644, %2 : vector<8x16xf32>
    %646 = arith.addf %642, %645 : vector<8x16xf32>
    %647 = vector.extract_strided_slice %582 {offsets = [0, 3], sizes = [8, 1], strides = [1, 1]} : vector<8x4xf32> to vector<8x1xf32>
    %648 = vector.broadcast %647 : vector<8x1xf32> to vector<8x16xf32>
    %649 = arith.mulf %648, %3 : vector<8x16xf32>
    %650 = arith.addf %646, %649 : vector<8x16xf32>
    %651 = arith.negf %650 : vector<8x16xf32>
    %652 = math.exp %651 : vector<8x16xf32>
    %cst_40 = arith.constant 1.000000e+00 : f32
    %653 = vector.broadcast %cst_40 : f32 to vector<8x16xf32>
    %654 = arith.addf %653, %652 : vector<8x16xf32>
    %655 = arith.divf %653, %654 : vector<8x16xf32>
    %656 = math.tanh %650 : vector<8x16xf32>
    %657 = vector.extract_strided_slice %655 {offsets = [0, 0], sizes = [8, 4], strides = [1, 1]} : vector<8x16xf32> to vector<8x4xf32>
    %658 = vector.extract_strided_slice %655 {offsets = [0, 4], sizes = [8, 4], strides = [1, 1]} : vector<8x16xf32> to vector<8x4xf32>
    %659 = vector.extract_strided_slice %656 {offsets = [0, 8], sizes = [8, 4], strides = [1, 1]} : vector<8x16xf32> to vector<8x4xf32>
    %660 = vector.extract_strided_slice %655 {offsets = [0, 12], sizes = [8, 4], strides = [1, 1]} : vector<8x16xf32> to vector<8x4xf32>
    %661 = arith.mulf %658, %580 : vector<8x4xf32>
    %662 = arith.mulf %657, %659 : vector<8x4xf32>
    %663 = arith.addf %661, %662 : vector<8x4xf32>
    %664 = math.tanh %663 : vector<8x4xf32>
    %665 = arith.mulf %660, %664 : vector<8x4xf32>
    %666 = vector.extract_strided_slice %665 {offsets = [0, 0], sizes = [8, 1], strides = [1, 1]} : vector<8x4xf32> to vector<8x1xf32>
    %667 = vector.broadcast %666 : vector<8x1xf32> to vector<8x16xf32>
    %668 = arith.mulf %667, %4 : vector<8x16xf32>
    %669 = arith.addf %633, %668 : vector<8x16xf32>
    %670 = vector.extract_strided_slice %665 {offsets = [0, 1], sizes = [8, 1], strides = [1, 1]} : vector<8x4xf32> to vector<8x1xf32>
    %671 = vector.broadcast %670 : vector<8x1xf32> to vector<8x16xf32>
    %672 = arith.mulf %671, %5 : vector<8x16xf32>
    %673 = arith.addf %669, %672 : vector<8x16xf32>
    %674 = vector.extract_strided_slice %665 {offsets = [0, 2], sizes = [8, 1], strides = [1, 1]} : vector<8x4xf32> to vector<8x1xf32>
    %675 = vector.broadcast %674 : vector<8x1xf32> to vector<8x16xf32>
    %676 = arith.mulf %675, %6 : vector<8x16xf32>
    %677 = arith.addf %673, %676 : vector<8x16xf32>
    %678 = vector.extract_strided_slice %665 {offsets = [0, 3], sizes = [8, 1], strides = [1, 1]} : vector<8x4xf32> to vector<8x1xf32>
    %679 = vector.broadcast %678 : vector<8x1xf32> to vector<8x16xf32>
    %680 = arith.mulf %679, %7 : vector<8x16xf32>
    %681 = arith.addf %677, %680 : vector<8x16xf32>
    %682 = arith.negf %681 : vector<8x16xf32>
    %683 = math.exp %682 : vector<8x16xf32>
    %cst_41 = arith.constant 1.000000e+00 : f32
    %684 = vector.broadcast %cst_41 : f32 to vector<8x16xf32>
    %685 = arith.addf %684, %683 : vector<8x16xf32>
    %686 = arith.divf %684, %685 : vector<8x16xf32>
    %687 = math.tanh %681 : vector<8x16xf32>
    %688 = vector.extract_strided_slice %686 {offsets = [0, 0], sizes = [8, 4], strides = [1, 1]} : vector<8x16xf32> to vector<8x4xf32>
    %689 = vector.extract_strided_slice %686 {offsets = [0, 4], sizes = [8, 4], strides = [1, 1]} : vector<8x16xf32> to vector<8x4xf32>
    %690 = vector.extract_strided_slice %687 {offsets = [0, 8], sizes = [8, 4], strides = [1, 1]} : vector<8x16xf32> to vector<8x4xf32>
    %691 = vector.extract_strided_slice %686 {offsets = [0, 12], sizes = [8, 4], strides = [1, 1]} : vector<8x16xf32> to vector<8x4xf32>
    %692 = arith.mulf %689, %611 : vector<8x4xf32>
    %693 = arith.mulf %688, %690 : vector<8x4xf32>
    %694 = arith.addf %692, %693 : vector<8x4xf32>
    %695 = math.tanh %694 : vector<8x4xf32>
    %696 = arith.mulf %691, %695 : vector<8x4xf32>
    %697 = arith.mulf %696, %14 : vector<8x4xf32>
    %cst_42 = arith.constant dense<0.000000e+00> : vector<8xf32>
    %698 = vector.multi_reduction <add>, %697, %cst_42 [1] : vector<8x4xf32> to vector<8xf32>
    %699 = vector.shape_cast %698 : vector<8xf32> to vector<8x1xf32>
    %700 = arith.addf %699, %16 : vector<8x1xf32>
    %701 = tpu.concatenate %119, %202, %285, %368, %451, %534, %617, %700 in 1 : vector<8x1xf32>, vector<8x1xf32>, vector<8x1xf32>, vector<8x1xf32>, vector<8x1xf32>, vector<8x1xf32>, vector<8x1xf32>, vector<8x1xf32> -> vector<8x8xf32>
    %c0_43 = arith.constant 0 : index
    %c0_44 = arith.constant 0 : index
    %702 = vector.load %arg2[%c0_43, %c0_44] : memref<8x8xf32, #tpu.memory_space<vmem>>, vector<8x8xf32>
    tpu.vector_store %arg2[%c0_43, %c0_44], %701 {strides = array<i32>} : memref<8x8xf32, #tpu.memory_space<vmem>>, vector<8x8xf32>,
    return
  }
}

</mosaic_0001>

<bundles_post_ra>
// kernel: tpu_custom_call.1
= control target key start
LH: loop header
LB: loop body
LE: loop exit
PB: predicated region body
PF: predicated region fallthrough
CT: control target
= control target key end

     0   :  { %v1394_v1 = vmov 0   ;;  %s1983_s0 = inlined_call_operand.vmem [shape: f32[64,2], index: 0, kind: input, shape index: {}]   ;;  %s1984_s1 = inlined_call_operand.vmem [shape: f32[136,16], index: 1, kind: input, shape index: {}]   ;;  %s1985_s2 = inlined_call_operand.hbm [shape: f32[8,8], index: 2, kind: output, shape index: {}]  }
   0x1   :  { %v29_v0 = vld [vmem:[%s1983_s0] sm:$0xff]  ;;  %1153 = vset.pattern.permute.xlu0 %v1394_v1  ;;  %1155 = vset.pattern.permute.xlu1 %v1394_v1 }
   0x2   :  { %7 = vsyncpa [#allocation3], 0  ;;  %47 = vperm.xlu0 %1153, %v29_v0   ;;  %v1395_v2 = vmov 1   ;;  %v41_v3 = vlaneseq  ;;  %v27_v6 = vld [vmem:[%s1984_s1] sm:$0x3]  ;;  %v1449_v13 = vld [vmem:[%s1984_s1 + $0x10] sm:$0xff] }
   0x3   :  { %v1444_v12 = vld [vmem:[%s1984_s1 + $0x8] ss:$0 sm:$0xff]  ;;  %v1454_v15 = vld [vmem:[%s1984_s1 + $0x18] sm:$0xff]  ;;  %v161_v18 = vmul.f32 0.0, %v1449_v13  ;;  %v1462_v19 = vld [vmem:[%s1984_s1 + $0x20] sm:$0xff]  ;;  %s1396_s23 = smov 120  }
   0x4   :  { %v42_v4 = vshrl.u32 %v41_v3, 7  ;;  %v163_v21 = vmul.f32 0.0, %v1454_v15  ;;  %v1468_v22 = vld [vmem:[%s1984_s1 + $0x28] sm:$0xff]  ;;  %v165_v24 = vmul.f32 0.0, %v1462_v19  ;;  %s1397_s24 = smov 4   ;;  %v1398_v39 = vmov 12  }
   0x5   :  { %v167_v26 = vmul.f32 0.0, %v1468_v22  ;;  %s1399_s25 = smov 8   ;;  %v30_v41 = vld [vmem:[%s1983_s0 + $0x8] sm:$0xff]  ;;  %v1400_v42 = vmov 13   ;;  %v1401_v45 = vmov 14   ;;  %v1402_v46 = vmov 15  }
   0x6   :  { %1154 = vset.pattern.permute.xlu0 %v1395_v2  ;;  %v43_v5 = vsub.s32 0, %v42_v4  ;;  %v103_v8 = vsub.s32 1, %v42_v4  ;;  %v1491_v47 = vld [vmem:[%s1984_s1 + $0x50] sm:$0xff]  ;;  %v1497_v49 = vld [vmem:[%s1984_s1 + $0x58] sm:$0xff]  ;;  %v1509_v53 = vld [vmem:[%s1984_s1 + $0x60] sm:$0xff]  ;;  %s1403_s9 = smov 12  }
   0x7   :  { %106 = vperm.xlu0 %1154, %v29_v0   ;;  %v153_v48 = vmul.f32 0.0, %v1491_v47  ;;  %v1502_v50 = vld [vmem:[%s1984_s1 + $0x70] sm:$0xff]  ;;  %v155_v52 = vmul.f32 0.0, %v1497_v49  ;;  %v157_v55 = vmul.f32 0.0, %v1509_v53  ;;  %v1515_v56 = vld [vmem:[%s1984_s1 + $0x68] sm:$0xff]  ;;  %v1528_v4 = vld [vmem:[%s1984_s1 + $0x38] sm:$0xff] }
   0x8   :  { %v1436_v7 = vrot.slane %v27_v6, %v43_v5  ;;  %v1439_v11 = vrot.slane %v27_v6, %v103_v8  ;;  %v159_v59 = vmul.f32 0.0, %v1515_v56  ;;  %v1521_v60 = vld [vmem:[%s1984_s1 + $0x30] sm:$0xff]  ;;  %v1533_v6 = vld [vmem:[%s1984_s1 + $0x40] sm:$0xff]  ;;  %vm251_vm0 = vcmask 31744   ;;  %s1405_s11 = smov 2   ;;  %s1406_s12 = smov 3  }
   0x9   :  { %v154_v51 = vadd.f32 %v153_v48, %v1502_v50  ;;  %s1407_s13 = smov 1   ;;  %s1408_s14 = smov 5   ;;  %vm1089_vm1 = vcmask 7168   ;;  %vm1091_vm2 = vcmask 15360   ;;  %vm1093_vm3 = vcmask 23552  }
   0xa   :  { %vm1096_vm4 = vcmask 39936   ;;  %vm1098_vm5 = vcmask 48128   ;;  %vm1100_vm6 = vcmask 56320   ;;  %vm1102_vm7 = vcmask 64512  }
   0xb   :  { %1156 = vset.pattern.permute.xlu0 %v1398_v39  ;;  %v156_v54 = vadd.f32 %v155_v52, %v154_v51 }
   0xd   :  { %v158_v58 = vadd.f32 %v157_v55, %v156_v54 }
   0xf   :  { %v160_v61 = vadd.f32 %v159_v59, %v158_v58 }
  0x7d   :  { %v48_v9 = vpop.permute.xlu0 %47 }
  0x7e   :  { %v85_v10 = vmul.f32 %v48_v9, %v1436_v7 }
  0x80   :  { %v93_v16 = vadd.f32 %v1444_v12, %v85_v10 }
  0x82   :  { %v107_v14 = vpop.permute.xlu0 %106 }
  0x83   :  { %v137_v17 = vmul.f32 %v107_v14, %v1439_v11 }
  0x85   :  { %v145_v20 = vadd.f32 %v137_v17, %v93_v16 }
  0x87   :  { %v162_v23 = vadd.f32 %v161_v18, %v145_v20 }
  0x89   :  { %v164_v25 = vadd.f32 %v163_v21, %v162_v23  ;;  %v1543_v23 = vld [vmem:[%s1984_s1 + $0x48] sm:$0xff] }
  0x8b   :  { %v166_v27 = vadd.f32 %v165_v24, %v164_v25 }
  0x8d   :  { %v168_v28 = vadd.f32 %v167_v26, %v166_v27 }
  0x8f   :  { %1230 = vtanh.f32 %v168_v28  ;;  %v1119_v30 = vmul.f32 -1.442695, %v168_v28 }
  0x91   :  { %1232 = vpow2.f32 %v1119_v30 }
  0x9c   :  { %v1231_v29 = vpop.eup %1230 }
  0x9d   :  { %178 = vrot.lane.b32.xlu1 %v1231_v29, %s1396_s23 }
  0x9e   :  { %v1233_v31 = vpop.eup %1232 }
  0x9f   :  { %v172_v32 = vadd.f32 1.0, %v1233_v31 }
  0xa1   :  { %1234 = vrcp.f32 %v172_v32 }
  0xae   :  { %v1235_v33 = vpop.eup %1234 }
  0xaf   :  { %v176_v36 = vmul.f32 0.0, %v1235_v33 }
 0x10f   :  { %v179_v34 = vpop.permute.xlu1 %178 }
 0x110   :  { %v181_v35 = vmul.f32 %v1235_v33, %v179_v34 }
 0x112   :  { %183 = vrot.lane.b32.xlu1 %v181_v35, %s1397_s24 }
 0x184   :  { %v184_v37 = vpop.permute.xlu1 %183 }
 0x185   :  { %v1474_v38 = vadd.f32 %v184_v37, %v176_v36 }
 0x187   :  { %1236 = vtanh.f32 %v1474_v38 }
 0x194   :  { %v1237_v40 = vpop.eup %1236 }
 0x195   :  { %189 = vrot.lane.b32.xlu1 %v1237_v40, %s1399_s25 }
 0x199   :  { %52 = vperm.xlu1 %1155, %v30_v41  }
 0x19d   :  { %1157 = vset.pattern.permute.xlu1 %v1400_v42 }
 0x207   :  { %v190_v43 = vpop.permute.xlu1 %189 }
 0x208   :  { %v192_v44 = vmul.f32 %v1235_v33, %v190_v43 }
 0x20a   :  { %201 = vperm.xlu1 %1157, %v192_v44   ;;  %195 = vperm.xlu0 %1156, %v192_v44  }
 0x20e   :  { %1159 = vset.pattern.permute.xlu1 %v1395_v2  ;;  %1158 = vset.pattern.permute.xlu0 %v1401_v45 }
 0x20f   :  { %110 = vperm.xlu1 %1159, %v30_v41   ;;  %207 = vperm.xlu0 %1158, %v192_v44  }
 0x213   :  { %1160 = vset.pattern.permute.xlu1 %v1402_v46  ;;  %1161 = vset.pattern.permute.xlu0 %v1398_v39 }
 0x214   :  { %213 = vperm.xlu1 %1160, %v192_v44   ;;  %v53_v57 = vpop.permute.xlu1 %52 }
 0x215   :  { %v86_v3 = vmul.f32 %v53_v57, %v1436_v7 }
 0x217   :  { %v94_v14 = vadd.f32 %v1444_v12, %v86_v3 }
 0x218   :  { %1162 = vset.pattern.permute.xlu1 %v1400_v42 }
 0x285   :  { %v196_v62 = vpop.permute.xlu0 %195  ;;  %v202_v63 = vpop.permute.xlu1 %201 }
 0x286   :  { %v198_v0 = vmul.f32 %v196_v62, %v1521_v60  ;;  %v204_v8 = vmul.f32 %v202_v63, %v1528_v4  ;;  %v281_v20 = vmul.f32 %v196_v62, %v1449_v13  ;;  %v283_v24 = vmul.f32 %v202_v63, %v1454_v15 }
 0x288   :  { %v199_v5 = vadd.f32 %v198_v0, %v160_v61 }
 0x28a   :  { %v208_v9 = vpop.permute.xlu0 %207  ;;  %v111_v10 = vpop.permute.xlu1 %110  ;;  %v205_v17 = vadd.f32 %v204_v8, %v199_v5 }
 0x28b   :  { %v138_v16 = vmul.f32 %v111_v10, %v1439_v11  ;;  %v210_v18 = vmul.f32 %v208_v9, %v1533_v6  ;;  %v285_v29 = vmul.f32 %v208_v9, %v1462_v19 }
 0x28d   :  { %v146_v21 = vadd.f32 %v138_v16, %v94_v14  ;;  %v211_v27 = vadd.f32 %v210_v18, %v205_v17  ;;  %v31_v14 = vld [vmem:[%s1983_s0 + $0x10] sm:$0xff] }
 0x28f   :  { %v282_v25 = vadd.f32 %v281_v20, %v146_v21  ;;  %v214_v26 = vpop.permute.xlu1 %213 }
 0x290   :  { %v216_v28 = vmul.f32 %v214_v26, %v1543_v23  ;;  %v287_v33 = vmul.f32 %v214_v26, %v1468_v22 }
 0x291   :  { %v284_v30 = vadd.f32 %v283_v24, %v282_v25 }
 0x292   :  { %v217_v31 = vadd.f32 %v216_v28, %v211_v27 }
 0x293   :  { %v286_v32 = vadd.f32 %v285_v29, %v284_v30 }
 0x294   :  { %1238 = vtanh.f32 %v217_v31  ;;  %v1120_v37 = vmul.f32 -1.442695, %v217_v31 }
 0x295   :  { %v288_v34 = vadd.f32 %v287_v33, %v286_v32 }
 0x297   :  { %1240 = vtanh.f32 %v288_v34  ;;  %v1121_v40 = vmul.f32 -1.442695, %v288_v34 }
 0x298   :  { %1242 = vpow2.f32 %v1120_v37 }
 0x299   :  { %1244 = vpow2.f32 %v1121_v40 }
 0x2a1   :  { %v1239_v35 = vpop.eup %1238 }
 0x2a2   :  { %227 = vrot.lane.b32.xlu0 %v1239_v35, %s1396_s23 }
 0x2a4   :  { %v1241_v36 = vpop.eup %1240 }
 0x2a5   :  { %298 = vrot.lane.b32.xlu1 %v1241_v36, %s1396_s23  ;;  %v1243_v41 = vpop.eup %1242 }
 0x2a6   :  { %v1245_v43 = vpop.eup %1244  ;;  %v221_v44 = vadd.f32 1.0, %v1243_v41 }
 0x2a7   :  { %v292_v48 = vadd.f32 1.0, %v1245_v43 }
 0x2a8   :  { %1246 = vrcp.f32 %v221_v44 }
 0x2a9   :  { %1248 = vrcp.f32 %v292_v48 }
 0x2b5   :  { %v1247_v51 = vpop.eup %1246 }
 0x2b6   :  { %v1249_v55 = vpop.eup %1248  ;;  %v225_v59 = vmul.f32 0.0, %v1247_v51 }
 0x2b7   :  { %v296_v63 = vmul.f32 %v1249_v55, %v1474_v38 }
 0x314   :  { %v228_v52 = vpop.permute.xlu0 %227 }
 0x315   :  { %v230_v54 = vmul.f32 %v1247_v51, %v228_v52 }
 0x317   :  { %v299_v57 = vpop.permute.xlu1 %298  ;;  %232 = vrot.lane.b32.xlu0 %v230_v54, %s1397_s24 }
 0x318   :  { %v301_v58 = vmul.f32 %v1249_v55, %v299_v57 }
 0x31a   :  { %303 = vrot.lane.b32.xlu1 %v301_v58, %s1397_s24 }
 0x389   :  { %v233_v61 = vpop.permute.xlu0 %232 }
 0x38a   :  { %v1553_v62 = vadd.f32 %v233_v61, %v225_v59 }
 0x38c   :  { %1250 = vtanh.f32 %v1553_v62  ;;  %v304_v0 = vpop.permute.xlu1 %303 }
 0x38d   :  { %v1557_v3 = vadd.f32 %v304_v0, %v296_v63 }
 0x38f   :  { %1252 = vtanh.f32 %v1557_v3 }
 0x399   :  { %v1251_v5 = vpop.eup %1250 }
 0x39a   :  { %238 = vrot.lane.b32.xlu0 %v1251_v5, %s1399_s25 }
 0x39c   :  { %v1253_v8 = vpop.eup %1252 }
 0x39d   :  { %309 = vrot.lane.b32.xlu1 %v1253_v8, %s1399_s25 }
 0x40c   :  { %v239_v9 = vpop.permute.xlu0 %238 }
 0x40d   :  { %v1562_v10 = vmul.f32 %v1247_v51, %v239_v9 }
 0x40f   :  { %264 = vperm.xlu1 %1162, %v1562_v10   ;;  %258 = vperm.xlu0 %1161, %v1562_v10   ;;  %v310_v38 = vpop.permute.xlu1 %309 }
 0x410   :  { %v312_v16 = vmul.f32 %v1249_v55, %v310_v38 }
 0x413   :  { %1163 = vset.pattern.permute.xlu1 %v1401_v45  ;;  %1164 = vset.pattern.permute.xlu0 %v1402_v46 }
 0x414   :  { %270 = vperm.xlu1 %1163, %v1562_v10   ;;  %276 = vperm.xlu0 %1164, %v1562_v10  }
 0x418   :  { %1166 = vset.pattern.permute.xlu1 %v1398_v39  ;;  %1165 = vset.pattern.permute.xlu0 %v1394_v1 }
 0x419   :  { %315 = vperm.xlu1 %1166, %v312_v16   ;;  %57 = vperm.xlu0 %1165, %v31_v14  }
 0x41d   :  { %1167 = vset.pattern.permute.xlu1 %v1400_v42  ;;  %1170 = vset.pattern.permute.xlu0 %v1402_v46 }
 0x41e   :  { %321 = vperm.xlu1 %1167, %v312_v16   ;;  %333 = vperm.xlu0 %1170, %v312_v16  }
 0x422   :  { %1168 = vset.pattern.permute.xlu1 %v1401_v45  ;;  %1172 = vset.pattern.permute.xlu0 %v1398_v39 }
 0x423   :  { %327 = vperm.xlu1 %1168, %v312_v16  }
 0x427   :  { %1169 = vset.pattern.permute.xlu1 %v1395_v2 }
 0x428   :  { %114 = vperm.xlu1 %1169, %v31_v14  }
 0x42c   :  { %1171 = vset.pattern.permute.xlu1 %v1398_v39 }
 0x48a   :  { %v265_v17 = vpop.permute.xlu1 %264  ;;  %v259_v18 = vpop.permute.xlu0 %258 }
 0x48b   :  { %v261_v20 = vmul.f32 %v259_v18, %v1491_v47  ;;  %v267_v24 = vmul.f32 %v265_v17, %v1497_v49 }
 0x48d   :  { %v262_v21 = vadd.f32 %v261_v20, %v1502_v50 }
 0x48f   :  { %v271_v25 = vpop.permute.xlu1 %270  ;;  %v268_v26 = vadd.f32 %v267_v24, %v262_v21  ;;  %v277_v28 = vpop.permute.xlu0 %276 }
 0x490   :  { %v273_v27 = vmul.f32 %v271_v25, %v1509_v53  ;;  %v279_v31 = vmul.f32 %v277_v28, %v1515_v56 }
 0x492   :  { %v274_v30 = vadd.f32 %v273_v27, %v268_v26 }
 0x494   :  { %v316_v29 = vpop.permute.xlu1 %315  ;;  %v58_v32 = vpop.permute.xlu0 %57  ;;  %v280_v33 = vadd.f32 %v279_v31, %v274_v30 }
 0x495   :  { %v318_v34 = vmul.f32 %v316_v29, %v1521_v60  ;;  %v87_v40 = vmul.f32 %v58_v32, %v1436_v7  ;;  %v396_v59 = vmul.f32 %v316_v29, %v1449_v13 }
 0x497   :  { %v319_v37 = vadd.f32 %v318_v34, %v280_v33  ;;  %v95_v54 = vadd.f32 %v1444_v12, %v87_v40 }
 0x499   :  { %v322_v35 = vpop.permute.xlu1 %321  ;;  %v334_v41 = vpop.permute.xlu0 %333 }
 0x49a   :  { %v324_v36 = vmul.f32 %v322_v35, %v1528_v4  ;;  %v336_v51 = vmul.f32 %v334_v41, %v1543_v23  ;;  %v398_v63 = vmul.f32 %v322_v35, %v1454_v15  ;;  %v402_v9 = vmul.f32 %v334_v41, %v1468_v22 }
 0x49c   :  { %v325_v44 = vadd.f32 %v324_v36, %v319_v37 }
 0x49e   :  { %v328_v43 = vpop.permute.xlu1 %327 }
 0x49f   :  { %v330_v48 = vmul.f32 %v328_v43, %v1533_v6  ;;  %v400_v5 = vmul.f32 %v328_v43, %v1462_v19 }
 0x4a1   :  { %v331_v52 = vadd.f32 %v330_v48, %v325_v44 }
 0x4a3   :  { %v337_v55 = vadd.f32 %v336_v51, %v331_v52  ;;  %v115_v57 = vpop.permute.xlu1 %114 }
 0x4a4   :  { %v139_v58 = vmul.f32 %v115_v57, %v1439_v11 }
 0x4a5   :  { %1254 = vtanh.f32 %v337_v55  ;;  %v1122_v18 = vmul.f32 -1.442695, %v337_v55 }
 0x4a6   :  { %v147_v61 = vadd.f32 %v139_v58, %v95_v54 }
 0x4a8   :  { %v397_v0 = vadd.f32 %v396_v59, %v147_v61 }
 0x4aa   :  { %v399_v8 = vadd.f32 %v398_v63, %v397_v0 }
 0x4ac   :  { %v401_v38 = vadd.f32 %v400_v5, %v399_v8 }
 0x4ae   :  { %v403_v14 = vadd.f32 %v402_v9, %v401_v38 }
 0x4b0   :  { %1256 = vtanh.f32 %v403_v14  ;;  %v1123_v20 = vmul.f32 -1.442695, %v403_v14 }
 0x4b1   :  { %1258 = vpow2.f32 %v1122_v18 }
 0x4b2   :  { %v1255_v16 = vpop.eup %1254  ;;  %1260 = vpow2.f32 %v1123_v20 }
 0x4b3   :  { %347 = vrot.lane.b32.xlu1 %v1255_v16, %s1396_s23 }
 0x4bd   :  { %v1257_v17 = vpop.eup %1256 }
 0x4be   :  { %413 = vrot.lane.b32.xlu1 %v1257_v17, %s1396_s23  ;;  %v1259_v21 = vpop.eup %1258 }
 0x4bf   :  { %v341_v24 = vadd.f32 1.0, %v1259_v21  ;;  %v1261_v25 = vpop.eup %1260 }
 0x4c0   :  { %v407_v26 = vadd.f32 1.0, %v1261_v25 }
 0x4c1   :  { %1262 = vrcp.f32 %v341_v24 }
 0x4c2   :  { %1264 = vrcp.f32 %v407_v26 }
 0x4ce   :  { %v1263_v27 = vpop.eup %1262 }
 0x4cf   :  { %v1265_v30 = vpop.eup %1264  ;;  %v345_v33 = vmul.f32 %v1263_v27, %v1553_v62 }
 0x4d0   :  { %v411_v36 = vmul.f32 %v1265_v30, %v1557_v3  ;;  %v32_v3 = vld [vmem:[%s1983_s0 + $0x18] sm:$0xff] }
 0x525   :  { %v348_v28 = vpop.permute.xlu1 %347 }
 0x526   :  { %v350_v29 = vmul.f32 %v1263_v27, %v348_v28 }
 0x528   :  { %352 = vrot.lane.b32.xlu0 %v350_v29, %s1397_s24 }
 0x530   :  { %v414_v31 = vpop.permute.xlu1 %413 }
 0x531   :  { %v416_v32 = vmul.f32 %v1265_v30, %v414_v31 }
 0x533   :  { %418 = vrot.lane.b32.xlu1 %v416_v32, %s1397_s24 }
 0x59a   :  { %v353_v34 = vpop.permute.xlu0 %352 }
 0x59b   :  { %v1602_v35 = vadd.f32 %v353_v34, %v345_v33 }
 0x59d   :  { %1266 = vtanh.f32 %v1602_v35 }
 0x5a5   :  { %v419_v37 = vpop.permute.xlu1 %418 }
 0x5a6   :  { %v1606_v40 = vadd.f32 %v419_v37, %v411_v36 }
 0x5a8   :  { %1268 = vtanh.f32 %v1606_v40 }
 0x5aa   :  { %v1267_v41 = vpop.eup %1266 }
 0x5ab   :  { %358 = vrot.lane.b32.xlu0 %v1267_v41, %s1399_s25 }
 0x5b5   :  { %v1269_v43 = vpop.eup %1268 }
 0x5b6   :  { %424 = vrot.lane.b32.xlu1 %v1269_v43, %s1399_s25 }
 0x61d   :  { %v359_v44 = vpop.permute.xlu0 %358 }
 0x61e   :  { %v1611_v62 = vmul.f32 %v1263_v27, %v359_v44 }
 0x620   :  { %373 = vperm.xlu0 %1172, %v1611_v62  }
 0x624   :  { %1176 = vset.pattern.permute.xlu0 %v1402_v46 }
 0x625   :  { %391 = vperm.xlu0 %1176, %v1611_v62  }
 0x628   :  { %v425_v48 = vpop.permute.xlu1 %424 }
 0x629   :  { %v427_v51 = vmul.f32 %v1265_v30, %v425_v48  ;;  %1177 = vset.pattern.permute.xlu0 %v1394_v1 }
 0x62a   :  { %62 = vperm.xlu0 %1177, %v32_v3  }
 0x62b   :  { %430 = vperm.xlu1 %1171, %v427_v51  }
 0x62e   :  { %1180 = vset.pattern.permute.xlu0 %v1402_v46 }
 0x62f   :  { %1173 = vset.pattern.permute.xlu1 %v1400_v42  ;;  %448 = vperm.xlu0 %1180, %v427_v51  }
 0x630   :  { %379 = vperm.xlu1 %1173, %v1611_v62  }
 0x633   :  { %1182 = vset.pattern.permute.xlu0 %v1398_v39 }
 0x634   :  { %1174 = vset.pattern.permute.xlu1 %v1401_v45 }
 0x635   :  { %385 = vperm.xlu1 %1174, %v1611_v62  }
 0x639   :  { %1175 = vset.pattern.permute.xlu1 %v1400_v42 }
 0x63a   :  { %436 = vperm.xlu1 %1175, %v427_v51  }
 0x63e   :  { %1178 = vset.pattern.permute.xlu1 %v1401_v45 }
 0x63f   :  { %442 = vperm.xlu1 %1178, %v427_v51  }
 0x643   :  { %1179 = vset.pattern.permute.xlu1 %v1395_v2 }
 0x644   :  { %118 = vperm.xlu1 %1179, %v32_v3  }
 0x648   :  { %1181 = vset.pattern.permute.xlu1 %v1398_v39 }
 0x69b   :  { %v374_v54 = vpop.permute.xlu0 %373 }
 0x69c   :  { %v376_v55 = vmul.f32 %v374_v54, %v1491_v47 }
 0x69e   :  { %v377_v59 = vadd.f32 %v376_v55, %v1502_v50 }
 0x6a0   :  { %v392_v61 = vpop.permute.xlu0 %391 }
 0x6a1   :  { %v394_v8 = vmul.f32 %v392_v61, %v1515_v56 }
 0x6a5   :  { %v63_v38 = vpop.permute.xlu0 %62 }
 0x6a6   :  { %v431_v52 = vpop.permute.xlu1 %430  ;;  %v88_v21 = vmul.f32 %v63_v38, %v1436_v7 }
 0x6a7   :  { %v433_v14 = vmul.f32 %v431_v52, %v1521_v60  ;;  %v511_v34 = vmul.f32 %v431_v52, %v1449_v13 }
 0x6a8   :  { %v96_v30 = vadd.f32 %v1444_v12, %v88_v21 }
 0x6aa   :  { %v449_v24 = vpop.permute.xlu0 %448 }
 0x6ab   :  { %v380_v57 = vpop.permute.xlu1 %379  ;;  %v451_v28 = vmul.f32 %v449_v24, %v1543_v23  ;;  %v517_v3 = vmul.f32 %v449_v24, %v1468_v22 }
 0x6ac   :  { %v382_v58 = vmul.f32 %v380_v57, %v1497_v49 }
 0x6ae   :  { %v383_v0 = vadd.f32 %v382_v58, %v377_v59 }
 0x6b0   :  { %v386_v63 = vpop.permute.xlu1 %385 }
 0x6b1   :  { %v388_v5 = vmul.f32 %v386_v63, %v1509_v53 }
 0x6b3   :  { %v389_v9 = vadd.f32 %v388_v5, %v383_v0 }
 0x6b5   :  { %v395_v16 = vadd.f32 %v394_v8, %v389_v9  ;;  %v437_v17 = vpop.permute.xlu1 %436 }
 0x6b6   :  { %v439_v20 = vmul.f32 %v437_v17, %v1528_v4  ;;  %v513_v37 = vmul.f32 %v437_v17, %v1454_v15 }
 0x6b7   :  { %v434_v18 = vadd.f32 %v433_v14, %v395_v16 }
 0x6b9   :  { %v440_v26 = vadd.f32 %v439_v20, %v434_v18 }
 0x6ba   :  { %v443_v25 = vpop.permute.xlu1 %442 }
 0x6bb   :  { %v445_v27 = vmul.f32 %v443_v25, %v1533_v6  ;;  %v515_v43 = vmul.f32 %v443_v25, %v1462_v19 }
 0x6bd   :  { %v446_v29 = vadd.f32 %v445_v27, %v440_v26 }
 0x6bf   :  { %v452_v31 = vadd.f32 %v451_v28, %v446_v29  ;;  %v119_v32 = vpop.permute.xlu1 %118 }
 0x6c0   :  { %v140_v33 = vmul.f32 %v119_v32, %v1439_v11 }
 0x6c1   :  { %1270 = vtanh.f32 %v452_v31  ;;  %v1124_v57 = vmul.f32 -1.442695, %v452_v31 }
 0x6c2   :  { %v148_v36 = vadd.f32 %v140_v33, %v96_v30 }
 0x6c4   :  { %v512_v41 = vadd.f32 %v511_v34, %v148_v36 }
 0x6c6   :  { %v514_v44 = vadd.f32 %v513_v37, %v512_v41 }
 0x6c8   :  { %v516_v48 = vadd.f32 %v515_v43, %v514_v44 }
 0x6ca   :  { %v518_v51 = vadd.f32 %v517_v3, %v516_v48 }
 0x6cc   :  { %1272 = vtanh.f32 %v518_v51  ;;  %v1125_v52 = vmul.f32 -1.442695, %v518_v51 }
 0x6cd   :  { %1274 = vpow2.f32 %v1124_v57 }
 0x6ce   :  { %v1271_v54 = vpop.eup %1270  ;;  %1276 = vpow2.f32 %v1125_v52 }
 0x6cf   :  { %462 = vrot.lane.b32.xlu1 %v1271_v54, %s1396_s23 }
 0x6d9   :  { %v1273_v55 = vpop.eup %1272 }
 0x6da   :  { %528 = vrot.lane.b32.xlu1 %v1273_v55, %s1396_s23  ;;  %v1275_v58 = vpop.eup %1274 }
 0x6db   :  { %v456_v59 = vadd.f32 1.0, %v1275_v58  ;;  %v1277_v61 = vpop.eup %1276 }
 0x6dc   :  { %v522_v63 = vadd.f32 1.0, %v1277_v61 }
 0x6dd   :  { %1278 = vrcp.f32 %v456_v59 }
 0x6de   :  { %1280 = vrcp.f32 %v522_v63 }
 0x6ea   :  { %v1279_v0 = vpop.eup %1278 }
 0x6eb   :  { %v1281_v9 = vpop.eup %1280  ;;  %v460_v16 = vmul.f32 %v1279_v0, %v1602_v35 }
 0x6ec   :  { %v526_v20 = vmul.f32 %v1281_v9, %v1606_v40  ;;  %v33_v40 = vld [vmem:[%s1983_s0 + $0x20] sm:$0xff] }
 0x741   :  { %v463_v5 = vpop.permute.xlu1 %462 }
 0x742   :  { %v465_v8 = vmul.f32 %v1279_v0, %v463_v5 }
 0x744   :  { %467 = vrot.lane.b32.xlu0 %v465_v8, %s1397_s24 }
 0x74c   :  { %v529_v38 = vpop.permute.xlu1 %528 }
 0x74d   :  { %v531_v14 = vmul.f32 %v1281_v9, %v529_v38 }
 0x74f   :  { %533 = vrot.lane.b32.xlu1 %v531_v14, %s1397_s24 }
 0x7b6   :  { %v468_v17 = vpop.permute.xlu0 %467 }
 0x7b7   :  { %v1651_v18 = vadd.f32 %v468_v17, %v460_v16 }
 0x7b9   :  { %1282 = vtanh.f32 %v1651_v18 }
 0x7c1   :  { %v534_v21 = vpop.permute.xlu1 %533 }
 0x7c2   :  { %v1655_v24 = vadd.f32 %v534_v21, %v526_v20 }
 0x7c4   :  { %1284 = vtanh.f32 %v1655_v24 }
 0x7c6   :  { %v1283_v25 = vpop.eup %1282 }
 0x7c7   :  { %473 = vrot.lane.b32.xlu0 %v1283_v25, %s1399_s25 }
 0x7d1   :  { %v1285_v26 = vpop.eup %1284 }
 0x7d2   :  { %539 = vrot.lane.b32.xlu1 %v1285_v26, %s1399_s25 }
 0x839   :  { %v474_v27 = vpop.permute.xlu0 %473 }
 0x83a   :  { %v1660_v35 = vmul.f32 %v1279_v0, %v474_v27 }
 0x83c   :  { %488 = vperm.xlu0 %1182, %v1660_v35  }
 0x840   :  { %1186 = vset.pattern.permute.xlu0 %v1402_v46 }
 0x841   :  { %506 = vperm.xlu0 %1186, %v1660_v35  }
 0x844   :  { %v540_v28 = vpop.permute.xlu1 %539 }
 0x845   :  { %v542_v29 = vmul.f32 %v1281_v9, %v540_v28  ;;  %1187 = vset.pattern.permute.xlu0 %v1394_v1 }
 0x846   :  { %67 = vperm.xlu0 %1187, %v33_v40  }
 0x847   :  { %545 = vperm.xlu1 %1181, %v542_v29  }
 0x84a   :  { %1190 = vset.pattern.permute.xlu0 %v1402_v46 }
 0x84b   :  { %1183 = vset.pattern.permute.xlu1 %v1400_v42  ;;  %563 = vperm.xlu0 %1190, %v542_v29  }
 0x84c   :  { %494 = vperm.xlu1 %1183, %v1660_v35  }
 0x84f   :  { %1192 = vset.pattern.permute.xlu0 %v1398_v39 }
 0x850   :  { %1184 = vset.pattern.permute.xlu1 %v1401_v45 }
 0x851   :  { %500 = vperm.xlu1 %1184, %v1660_v35  }
 0x855   :  { %1185 = vset.pattern.permute.xlu1 %v1400_v42 }
 0x856   :  { %551 = vperm.xlu1 %1185, %v542_v29  }
 0x85a   :  { %1188 = vset.pattern.permute.xlu1 %v1401_v45 }
 0x85b   :  { %557 = vperm.xlu1 %1188, %v542_v29  }
 0x85f   :  { %1189 = vset.pattern.permute.xlu1 %v1395_v2 }
 0x860   :  { %122 = vperm.xlu1 %1189, %v33_v40  }
 0x864   :  { %1191 = vset.pattern.permute.xlu1 %v1398_v39 }
 0x8b7   :  { %v489_v31 = vpop.permute.xlu0 %488 }
 0x8b8   :  { %v491_v32 = vmul.f32 %v489_v31, %v1491_v47 }
 0x8ba   :  { %v492_v36 = vadd.f32 %v491_v32, %v1502_v50 }
 0x8bc   :  { %v507_v37 = vpop.permute.xlu0 %506 }
 0x8bd   :  { %v509_v3 = vmul.f32 %v507_v37, %v1515_v56 }
 0x8c1   :  { %v68_v51 = vpop.permute.xlu0 %67 }
 0x8c2   :  { %v546_v30 = vpop.permute.xlu1 %545  ;;  %v89_v59 = vmul.f32 %v68_v51, %v1436_v7 }
 0x8c3   :  { %v548_v54 = vmul.f32 %v546_v30, %v1521_v60  ;;  %v626_v20 = vmul.f32 %v546_v30, %v1449_v13 }
 0x8c4   :  { %v97_v38 = vadd.f32 %v1444_v12, %v89_v59 }
 0x8c6   :  { %v564_v61 = vpop.permute.xlu0 %563 }
 0x8c7   :  { %v495_v33 = vpop.permute.xlu1 %494  ;;  %v566_v8 = vmul.f32 %v564_v61, %v1543_v23  ;;  %v632_v28 = vmul.f32 %v564_v61, %v1468_v22 }
 0x8c8   :  { %v497_v34 = vmul.f32 %v495_v33, %v1497_v49 }
 0x8ca   :  { %v498_v43 = vadd.f32 %v497_v34, %v492_v36 }
 0x8cc   :  { %v501_v41 = vpop.permute.xlu1 %500 }
 0x8cd   :  { %v503_v44 = vmul.f32 %v501_v41, %v1509_v53 }
 0x8cf   :  { %v504_v48 = vadd.f32 %v503_v44, %v498_v43 }
 0x8d1   :  { %v510_v55 = vadd.f32 %v509_v3, %v504_v48  ;;  %v552_v57 = vpop.permute.xlu1 %551 }
 0x8d2   :  { %v554_v58 = vmul.f32 %v552_v57, %v1528_v4  ;;  %v628_v25 = vmul.f32 %v552_v57, %v1454_v15 }
 0x8d3   :  { %v549_v52 = vadd.f32 %v548_v54, %v510_v55 }
 0x8d5   :  { %v555_v0 = vadd.f32 %v554_v58, %v549_v52 }
 0x8d6   :  { %v558_v63 = vpop.permute.xlu1 %557 }
 0x8d7   :  { %v560_v5 = vmul.f32 %v558_v63, %v1533_v6  ;;  %v630_v27 = vmul.f32 %v558_v63, %v1462_v19 }
 0x8d9   :  { %v561_v9 = vadd.f32 %v560_v5, %v555_v0 }
 0x8db   :  { %v567_v14 = vadd.f32 %v566_v8, %v561_v9  ;;  %v123_v16 = vpop.permute.xlu1 %122 }
 0x8dc   :  { %v141_v17 = vmul.f32 %v123_v16, %v1439_v11 }
 0x8dd   :  { %1286 = vtanh.f32 %v567_v14  ;;  %v1126_v34 = vmul.f32 -1.442695, %v567_v14 }
 0x8de   :  { %v149_v21 = vadd.f32 %v141_v17, %v97_v38 }
 0x8e0   :  { %v627_v26 = vadd.f32 %v626_v20, %v149_v21 }
 0x8e2   :  { %v629_v40 = vadd.f32 %v628_v25, %v627_v26 }
 0x8e4   :  { %v631_v29 = vadd.f32 %v630_v27, %v629_v40 }
 0x8e6   :  { %v633_v31 = vadd.f32 %v632_v28, %v631_v29 }
 0x8e8   :  { %1288 = vtanh.f32 %v633_v31  ;;  %v1127_v30 = vmul.f32 -1.442695, %v633_v31 }
 0x8e9   :  { %1290 = vpow2.f32 %v1126_v34 }
 0x8ea   :  { %v1287_v32 = vpop.eup %1286  ;;  %1292 = vpow2.f32 %v1127_v30 }
 0x8eb   :  { %577 = vrot.lane.b32.xlu1 %v1287_v32, %s1396_s23 }
 0x8f5   :  { %v1289_v33 = vpop.eup %1288 }
 0x8f6   :  { %643 = vrot.lane.b32.xlu1 %v1289_v33, %s1396_s23  ;;  %v1291_v36 = vpop.eup %1290 }
 0x8f7   :  { %v571_v37 = vadd.f32 1.0, %v1291_v36  ;;  %v1293_v41 = vpop.eup %1292 }
 0x8f8   :  { %v637_v43 = vadd.f32 1.0, %v1293_v41 }
 0x8f9   :  { %1294 = vrcp.f32 %v571_v37 }
 0x8fa   :  { %1296 = vrcp.f32 %v637_v43 }
 0x906   :  { %v1295_v44 = vpop.eup %1294 }
 0x907   :  { %v1297_v51 = vpop.eup %1296  ;;  %v575_v57 = vmul.f32 %v1295_v44, %v1651_v18 }
 0x908   :  { %v641_v59 = vmul.f32 %v1297_v51, %v1655_v24  ;;  %v34_v24 = vld [vmem:[%s1983_s0 + $0x28] sm:$0xff] }
 0x95d   :  { %v578_v3 = vpop.permute.xlu1 %577 }
 0x95e   :  { %v580_v48 = vmul.f32 %v1295_v44, %v578_v3 }
 0x960   :  { %582 = vrot.lane.b32.xlu0 %v580_v48, %s1397_s24 }
 0x968   :  { %v644_v54 = vpop.permute.xlu1 %643 }
 0x969   :  { %v646_v55 = vmul.f32 %v1297_v51, %v644_v54 }
 0x96b   :  { %648 = vrot.lane.b32.xlu1 %v646_v55, %s1397_s24 }
 0x9d2   :  { %v583_v52 = vpop.permute.xlu0 %582 }
 0x9d3   :  { %v1700_v58 = vadd.f32 %v583_v52, %v575_v57 }
 0x9d5   :  { %1298 = vtanh.f32 %v1700_v58 }
 0x9dd   :  { %v649_v61 = vpop.permute.xlu1 %648 }
 0x9de   :  { %v1704_v63 = vadd.f32 %v649_v61, %v641_v59 }
 0x9e0   :  { %1300 = vtanh.f32 %v1704_v63 }
 0x9e2   :  { %v1299_v0 = vpop.eup %1298 }
 0x9e3   :  { %588 = vrot.lane.b32.xlu0 %v1299_v0, %s1399_s25 }
 0x9ed   :  { %v1301_v5 = vpop.eup %1300 }
 0x9ee   :  { %654 = vrot.lane.b32.xlu1 %v1301_v5, %s1399_s25 }
 0xa55   :  { %v589_v8 = vpop.permute.xlu0 %588 }
 0xa56   :  { %v1709_v18 = vmul.f32 %v1295_v44, %v589_v8 }
 0xa58   :  { %603 = vperm.xlu0 %1192, %v1709_v18  }
 0xa5c   :  { %1196 = vset.pattern.permute.xlu0 %v1402_v46 }
 0xa5d   :  { %621 = vperm.xlu0 %1196, %v1709_v18  }
 0xa60   :  { %v655_v9 = vpop.permute.xlu1 %654 }
 0xa61   :  { %v657_v38 = vmul.f32 %v1297_v51, %v655_v9  ;;  %1197 = vset.pattern.permute.xlu0 %v1394_v1 }
 0xa62   :  { %72 = vperm.xlu0 %1197, %v34_v24  }
 0xa63   :  { %660 = vperm.xlu1 %1191, %v657_v38  }
 0xa66   :  { %1200 = vset.pattern.permute.xlu0 %v1402_v46 }
 0xa67   :  { %1193 = vset.pattern.permute.xlu1 %v1400_v42  ;;  %678 = vperm.xlu0 %1200, %v657_v38  }
 0xa68   :  { %609 = vperm.xlu1 %1193, %v1709_v18  }
 0xa6b   :  { %1202 = vset.pattern.permute.xlu0 %v1398_v39 }
 0xa6c   :  { %1194 = vset.pattern.permute.xlu1 %v1401_v45 }
 0xa6d   :  { %615 = vperm.xlu1 %1194, %v1709_v18  }
 0xa71   :  { %1195 = vset.pattern.permute.xlu1 %v1400_v42 }
 0xa72   :  { %666 = vperm.xlu1 %1195, %v657_v38  }
 0xa76   :  { %1198 = vset.pattern.permute.xlu1 %v1401_v45 }
 0xa77   :  { %672 = vperm.xlu1 %1198, %v657_v38  }
 0xa7b   :  { %1199 = vset.pattern.permute.xlu1 %v1395_v2 }
 0xa7c   :  { %126 = vperm.xlu1 %1199, %v34_v24  }
 0xa80   :  { %1201 = vset.pattern.permute.xlu1 %v1398_v39 }
 0xad3   :  { %v604_v16 = vpop.permute.xlu0 %603 }
 0xad4   :  { %v606_v17 = vmul.f32 %v604_v16, %v1491_v47 }
 0xad6   :  { %v607_v25 = vadd.f32 %v606_v17, %v1502_v50 }
 0xad8   :  { %v622_v26 = vpop.permute.xlu0 %621 }
 0xad9   :  { %v624_v29 = vmul.f32 %v622_v26, %v1515_v56 }
 0xadd   :  { %v73_v32 = vpop.permute.xlu0 %72 }
 0xade   :  { %v661_v14 = vpop.permute.xlu1 %660  ;;  %v90_v41 = vmul.f32 %v73_v32, %v1436_v7 }
 0xadf   :  { %v663_v33 = vmul.f32 %v661_v14, %v1521_v60  ;;  %v741_v61 = vmul.f32 %v661_v14, %v1449_v13 }
 0xae0   :  { %v98_v55 = vadd.f32 %v1444_v12, %v90_v41 }
 0xae2   :  { %v679_v43 = vpop.permute.xlu0 %678 }
 0xae3   :  { %v610_v20 = vpop.permute.xlu1 %609  ;;  %v681_v51 = vmul.f32 %v679_v43, %v1543_v23  ;;  %v747_v38 = vmul.f32 %v679_v43, %v1468_v22 }
 0xae4   :  { %v612_v21 = vmul.f32 %v610_v20, %v1497_v49 }
 0xae6   :  { %v613_v40 = vadd.f32 %v612_v21, %v607_v25 }
 0xae8   :  { %v616_v27 = vpop.permute.xlu1 %615 }
 0xae9   :  { %v618_v28 = vmul.f32 %v616_v27, %v1509_v53 }
 0xaeb   :  { %v619_v31 = vadd.f32 %v618_v28, %v613_v40 }
 0xaed   :  { %v625_v34 = vadd.f32 %v624_v29, %v619_v31  ;;  %v667_v30 = vpop.permute.xlu1 %666 }
 0xaee   :  { %v669_v37 = vmul.f32 %v667_v30, %v1528_v4  ;;  %v743_v5 = vmul.f32 %v667_v30, %v1454_v15 }
 0xaef   :  { %v664_v36 = vadd.f32 %v663_v33, %v625_v34 }
 0xaf1   :  { %v670_v3 = vadd.f32 %v669_v37, %v664_v36 }
 0xaf2   :  { %v673_v44 = vpop.permute.xlu1 %672 }
 0xaf3   :  { %v675_v48 = vmul.f32 %v673_v44, %v1533_v6  ;;  %v745_v24 = vmul.f32 %v673_v44, %v1462_v19 }
 0xaf5   :  { %v676_v54 = vadd.f32 %v675_v48, %v670_v3 }
 0xaf7   :  { %v682_v57 = vadd.f32 %v681_v51, %v676_v54  ;;  %v127_v52 = vpop.permute.xlu1 %126 }
 0xaf8   :  { %v142_v59 = vmul.f32 %v127_v52, %v1439_v11 }
 0xaf9   :  { %1302 = vtanh.f32 %v682_v57  ;;  %v1128_v21 = vmul.f32 -1.442695, %v682_v57 }
 0xafa   :  { %v150_v0 = vadd.f32 %v142_v59, %v98_v55 }
 0xafc   :  { %v742_v8 = vadd.f32 %v741_v61, %v150_v0 }
 0xafe   :  { %v744_v9 = vadd.f32 %v743_v5, %v742_v8 }
 0xb00   :  { %v746_v16 = vadd.f32 %v745_v24, %v744_v9 }
 0xb02   :  { %v748_v17 = vadd.f32 %v747_v38, %v746_v16 }
 0xb04   :  { %1304 = vtanh.f32 %v748_v17  ;;  %v1129_v13 = vmul.f32 -1.442695, %v748_v17 }
 0xb05   :  { %1306 = vpow2.f32 %v1128_v21 }
 0xb06   :  { %v1303_v12 = vpop.eup %1302  ;;  %1308 = vpow2.f32 %v1129_v13 }
 0xb07   :  { %692 = vrot.lane.b32.xlu1 %v1303_v12, %s1396_s23 }
 0xb11   :  { %v1305_v20 = vpop.eup %1304 }
 0xb12   :  { %758 = vrot.lane.b32.xlu1 %v1305_v20, %s1396_s23  ;;  %v1307_v15 = vpop.eup %1306 }
 0xb13   :  { %v686_v14 = vadd.f32 1.0, %v1307_v15  ;;  %v1309_v19 = vpop.eup %1308 }
 0xb14   :  { %v752_v25 = vadd.f32 1.0, %v1309_v19 }
 0xb15   :  { %1310 = vrcp.f32 %v686_v14 }
 0xb16   :  { %1312 = vrcp.f32 %v752_v25  ;;  %v1797_v25 = vld [vmem:[%s1984_s1 + $0x10] sm:$0xff] }
 0xb22   :  { %v1311_v22 = vpop.eup %1310 }
 0xb23   :  { %v1313_v40 = vpop.eup %1312  ;;  %v690_v31 = vmul.f32 %v1311_v22, %v1700_v58 }
 0xb24   :  { %v756_v34 = vmul.f32 %v1313_v40, %v1704_v63  ;;  %v35_v63 = vld [vmem:[%s1983_s0 + $0x30] sm:$0xff] }
 0xb79   :  { %v693_v26 = vpop.permute.xlu1 %692 }
 0xb7a   :  { %v695_v27 = vmul.f32 %v1311_v22, %v693_v26 }
 0xb7c   :  { %697 = vrot.lane.b32.xlu0 %v695_v27, %s1397_s24 }
 0xb84   :  { %v759_v28 = vpop.permute.xlu1 %758 }
 0xb85   :  { %v761_v29 = vmul.f32 %v1313_v40, %v759_v28 }
 0xb87   :  { %763 = vrot.lane.b32.xlu1 %v761_v29, %s1397_s24 }
 0xbee   :  { %v698_v32 = vpop.permute.xlu0 %697 }
 0xbef   :  { %v1749_v33 = vadd.f32 %v698_v32, %v690_v31  ;;  %v1815_v31 = vld [vmem:[%s1984_s1 + $0x28] sm:$0xff] }
 0xbf1   :  { %1314 = vtanh.f32 %v1749_v33 }
 0xbf9   :  { %v764_v30 = vpop.permute.xlu1 %763 }
 0xbfa   :  { %v1753_v36 = vadd.f32 %v764_v30, %v756_v34 }
 0xbfc   :  { %1316 = vtanh.f32 %v1753_v36 }
 0xbfe   :  { %v1315_v37 = vpop.eup %1314 }
 0xbff   :  { %703 = vrot.lane.b32.xlu0 %v1315_v37, %s1399_s25 }
 0xc09   :  { %v1317_v41 = vpop.eup %1316 }
 0xc0a   :  { %769 = vrot.lane.b32.xlu1 %v1317_v41, %s1399_s25 }
 0xc71   :  { %v704_v43 = vpop.permute.xlu0 %703 }
 0xc72   :  { %v1758_v58 = vmul.f32 %v1311_v22, %v704_v43  ;;  %v1803_v22 = vld [vmem:[%s1984_s1 + $0x18] sm:$0xff] }
 0xc74   :  { %718 = vperm.xlu0 %1202, %v1758_v58  }
 0xc78   :  { %1206 = vset.pattern.permute.xlu0 %v1402_v46 }
 0xc79   :  { %736 = vperm.xlu0 %1206, %v1758_v58  }
 0xc7c   :  { %v770_v44 = vpop.permute.xlu1 %769 }
 0xc7d   :  { %v772_v3 = vmul.f32 %v1313_v40, %v770_v44  ;;  %1207 = vset.pattern.permute.xlu0 %v1394_v1  ;;  %v1809_v40 = vld [vmem:[%s1984_s1 + $0x20] sm:$0xff] }
 0xc7e   :  { %77 = vperm.xlu0 %1207, %v35_v63  }
 0xc7f   :  { %775 = vperm.xlu1 %1201, %v772_v3  }
 0xc82   :  { %1210 = vset.pattern.permute.xlu0 %v1402_v46 }
 0xc83   :  { %1203 = vset.pattern.permute.xlu1 %v1400_v42  ;;  %793 = vperm.xlu0 %1210, %v772_v3  }
 0xc84   :  { %724 = vperm.xlu1 %1203, %v1758_v58  }
 0xc87   :  { %1212 = vset.pattern.permute.xlu0 %v1398_v39 }
 0xc88   :  { %1204 = vset.pattern.permute.xlu1 %v1401_v45 }
 0xc89   :  { %730 = vperm.xlu1 %1204, %v1758_v58  }
 0xc8d   :  { %1205 = vset.pattern.permute.xlu1 %v1400_v42 }
 0xc8e   :  { %781 = vperm.xlu1 %1205, %v772_v3  }
 0xc92   :  { %1208 = vset.pattern.permute.xlu1 %v1401_v45 }
 0xc93   :  { %787 = vperm.xlu1 %1208, %v772_v3  }
 0xc97   :  { %1209 = vset.pattern.permute.xlu1 %v1395_v2 }
 0xc98   :  { %130 = vperm.xlu1 %1209, %v35_v63  }
 0xc9c   :  { %1211 = vset.pattern.permute.xlu1 %v1398_v39 }
 0xcef   :  { %v719_v51 = vpop.permute.xlu0 %718 }
 0xcf0   :  { %v721_v54 = vmul.f32 %v719_v51, %v1491_v47 }
 0xcf2   :  { %v722_v52 = vadd.f32 %v721_v54, %v1502_v50 }
 0xcf4   :  { %v737_v59 = vpop.permute.xlu0 %736 }
 0xcf5   :  { %v739_v8 = vmul.f32 %v737_v59, %v1515_v56  ;;  %v1790_v56 = vld [vmem:[%s1984_s1 + $0x8] ss:$0 sm:$0xff] }
 0xcf9   :  { %v78_v9 = vpop.permute.xlu0 %77 }
 0xcfa   :  { %v776_v48 = vpop.permute.xlu1 %775 }
 0xcfb   :  { %v778_v38 = vmul.f32 %v776_v48, %v1521_v60 }
 0xcfe   :  { %v794_v20 = vpop.permute.xlu0 %793 }
 0xcff   :  { %v725_v55 = vpop.permute.xlu1 %724  ;;  %v862_v32 = vmul.f32 %v1815_v31, %v794_v20 }
 0xd00   :  { %v727_v57 = vmul.f32 %v725_v55, %v1497_v49  ;;  %v91_v49 = vmul.f32 %v78_v9, %v1436_v7 }
 0xd02   :  { %v728_v0 = vadd.f32 %v727_v57, %v722_v52  ;;  %v99_v60 = vadd.f32 %v1790_v56, %v91_v49 }
 0xd04   :  { %v731_v61 = vpop.permute.xlu1 %730 }
 0xd05   :  { %v733_v5 = vmul.f32 %v731_v61, %v1509_v53  ;;  %v796_v53 = vmul.f32 %v794_v20, %v1543_v23 }
 0xd07   :  { %v734_v24 = vadd.f32 %v733_v5, %v728_v0 }
 0xd09   :  { %v740_v16 = vadd.f32 %v739_v8, %v734_v24  ;;  %v782_v17 = vpop.permute.xlu1 %781 }
 0xd0a   :  { %v784_v47 = vmul.f32 %v782_v17, %v1528_v4  ;;  %v858_v26 = vmul.f32 %v1803_v22, %v782_v17 }
 0xd0b   :  { %v779_v12 = vadd.f32 %v778_v38, %v740_v16 }
 0xd0d   :  { %v785_v21 = vadd.f32 %v784_v47, %v779_v12 }
 0xd0e   :  { %v788_v50 = vpop.permute.xlu1 %787 }
 0xd0f   :  { %v790_v13 = vmul.f32 %v788_v50, %v1533_v6  ;;  %v856_v6 = vmul.f32 %v1797_v25, %v776_v48  ;;  %v860_v28 = vmul.f32 %v1809_v40, %v788_v50  ;;  %v1854_v50 = vld [vmem:[%s1984_s1 + $0x50] sm:$0xff] }
 0xd11   :  { %v791_v15 = vadd.f32 %v790_v13, %v785_v21 }
 0xd13   :  { %v797_v14 = vadd.f32 %v796_v53, %v791_v15  ;;  %v131_v19 = vpop.permute.xlu1 %130  ;;  %v1860_v53 = vld [vmem:[%s1984_s1 + $0x58] sm:$0xff]  ;;  %v1866_v15 = vld [vmem:[%s1984_s1 + $0x70] sm:$0xff] }
 0xd14   :  { %v143_v4 = vmul.f32 %v131_v19, %v1439_v11 }
 0xd15   :  { %1318 = vtanh.f32 %v797_v14  ;;  %v1130_v43 = vmul.f32 -1.442695, %v797_v14 }
 0xd16   :  { %v151_v23 = vadd.f32 %v143_v4, %v99_v60 }
 0xd18   :  { %v857_v27 = vadd.f32 %v856_v6, %v151_v23  ;;  %v1872_v6 = vld [vmem:[%s1984_s1 + $0x60] sm:$0xff] }
 0xd1a   :  { %v859_v29 = vadd.f32 %v858_v26, %v857_v27  ;;  %v1878_v26 = vld [vmem:[%s1984_s1 + $0x68] sm:$0xff] }
 0xd1c   :  { %v861_v34 = vadd.f32 %v860_v28, %v859_v29 }
 0xd1e   :  { %v863_v30 = vadd.f32 %v862_v32, %v861_v34  ;;  %v1884_v32 = vld [vmem:[%s1984_s1 + $0x30] sm:$0xff] }
 0xd20   :  { %1320 = vtanh.f32 %v863_v30  ;;  %v1131_v63 = vmul.f32 -1.442695, %v863_v30 }
 0xd21   :  { %1322 = vpow2.f32 %v1130_v43  ;;  %v1890_v43 = vld [vmem:[%s1984_s1 + $0x38] sm:$0xff] }
 0xd22   :  { %v1319_v37 = vpop.eup %1318  ;;  %1324 = vpow2.f32 %v1131_v63 }
 0xd23   :  { %807 = vrot.lane.b32.xlu1 %v1319_v37, %s1396_s23 }
 0xd2d   :  { %v1321_v41 = vpop.eup %1320 }
 0xd2e   :  { %873 = vrot.lane.b32.xlu1 %v1321_v41, %s1396_s23  ;;  %v1323_v44 = vpop.eup %1322 }
 0xd2f   :  { %v801_v3 = vadd.f32 1.0, %v1323_v44  ;;  %v1325_v48 = vpop.eup %1324 }
 0xd30   :  { %v867_v51 = vadd.f32 1.0, %v1325_v48 }
 0xd31   :  { %1326 = vrcp.f32 %v801_v3 }
 0xd32   :  { %1328 = vrcp.f32 %v867_v51  ;;  %v1896_v51 = vld [vmem:[%s1984_s1 + $0x40] sm:$0xff] }
 0xd3e   :  { %v1327_v54 = vpop.eup %1326 }
 0xd3f   :  { %v1329_v52 = vpop.eup %1328  ;;  %v805_v0 = vmul.f32 %v1327_v54, %v1749_v33 }
 0xd40   :  { %v871_v24 = vmul.f32 %v1329_v52, %v1753_v36  ;;  %v36_v36 = vld [vmem:[%s1983_s0 + $0x38] sm:$0xff]  ;;  %s1410_s0 = smov 7  }
 0xd95   :  { %v808_v55 = vpop.permute.xlu1 %807 }
 0xd96   :  { %v810_v57 = vmul.f32 %v1327_v54, %v808_v55 }
 0xd98   :  { %812 = vrot.lane.b32.xlu0 %v810_v57, %s1397_s24  ;;  %v1903_v57 = vld [vmem:[%s1984_s1 + $0x48] sm:$0xff] }
 0xda0   :  { %v874_v59 = vpop.permute.xlu1 %873 }
 0xda1   :  { %v876_v61 = vmul.f32 %v1329_v52, %v874_v59 }
 0xda3   :  { %878 = vrot.lane.b32.xlu1 %v876_v61, %s1397_s24 }
 0xe0a   :  { %v813_v5 = vpop.permute.xlu0 %812 }
 0xe0b   :  { %v1823_v8 = vadd.f32 %v813_v5, %v805_v0 }
 0xe0d   :  { %1330 = vtanh.f32 %v1823_v8 }
 0xe15   :  { %v879_v9 = vpop.permute.xlu1 %878 }
 0xe16   :  { %v1827_v38 = vadd.f32 %v879_v9, %v871_v24 }
 0xe18   :  { %1332 = vtanh.f32 %v1827_v38 }
 0xe1a   :  { %v1331_v16 = vpop.eup %1330 }
 0xe1b   :  { %818 = vrot.lane.b32.xlu0 %v1331_v16, %s1399_s25 }
 0xe25   :  { %v1333_v17 = vpop.eup %1332 }
 0xe26   :  { %884 = vrot.lane.b32.xlu1 %v1333_v17, %s1399_s25 }
 0xe8d   :  { %v819_v12 = vpop.permute.xlu0 %818 }
 0xe8e   :  { %v1832_v33 = vmul.f32 %v1327_v54, %v819_v12 }
 0xe90   :  { %833 = vperm.xlu0 %1212, %v1832_v33  }
 0xe94   :  { %1216 = vset.pattern.permute.xlu0 %v1402_v46 }
 0xe95   :  { %851 = vperm.xlu0 %1216, %v1832_v33  }
 0xe98   :  { %v885_v47 = vpop.permute.xlu1 %884 }
 0xe99   :  { %v887_v49 = vmul.f32 %v1329_v52, %v885_v47  ;;  %1217 = vset.pattern.permute.xlu0 %v1394_v1 }
 0xe9a   :  { %82 = vperm.xlu0 %1217, %v36_v36  }
 0xe9b   :  { %890 = vperm.xlu1 %1211, %v887_v49  }
 0xe9e   :  { %1220 = vset.pattern.permute.xlu0 %v1402_v46 }
 0xe9f   :  { %1213 = vset.pattern.permute.xlu1 %v1400_v42  ;;  %908 = vperm.xlu0 %1220, %v887_v49  }
 0xea0   :  { %839 = vperm.xlu1 %1213, %v1832_v33  }
 0xea3   :  { %1221 = vset.pattern.permute.xlu0 %v1398_v39 }
 0xea4   :  { %1214 = vset.pattern.permute.xlu1 %v1401_v45 }
 0xea5   :  { %845 = vperm.xlu1 %1214, %v1832_v33  }
 0xea9   :  { %1215 = vset.pattern.permute.xlu1 %v1400_v42 }
 0xeaa   :  { %896 = vperm.xlu1 %1215, %v887_v49  }
 0xeae   :  { %1218 = vset.pattern.permute.xlu1 %v1401_v45 }
 0xeaf   :  { %902 = vperm.xlu1 %1218, %v887_v49  }
 0xeb3   :  { %1219 = vset.pattern.permute.xlu1 %v1395_v2 }
 0xeb4   :  { %134 = vperm.xlu1 %1219, %v36_v36  }
 0xeb8   :  { %1222 = vset.pattern.permute.xlu1 %v1400_v42 }
 0xf0b   :  { %v834_v20 = vpop.permute.xlu0 %833 }
 0xf0c   :  { %v836_v21 = vmul.f32 %v1854_v50, %v834_v20 }
 0xf0e   :  { %v837_v60 = vadd.f32 %v1866_v15, %v836_v21 }
 0xf10   :  { %v852_v14 = vpop.permute.xlu0 %851 }
 0xf11   :  { %v854_v27 = vmul.f32 %v1878_v26, %v852_v14 }
 0xf15   :  { %v83_v29 = vpop.permute.xlu0 %82 }
 0xf16   :  { %v891_v1 = vpop.permute.xlu1 %890  ;;  %v92_v55 = vmul.f32 %v83_v29, %v1436_v7 }
 0xf17   :  { %v893_v34 = vmul.f32 %v1884_v32, %v891_v1  ;;  %v971_v9 = vmul.f32 %v1797_v25, %v891_v1 }
 0xf18   :  { %v100_v5 = vadd.f32 %v1790_v56, %v92_v55 }
 0xf1a   :  { %v909_v44 = vpop.permute.xlu0 %908 }
 0xf1b   :  { %v840_v13 = vpop.permute.xlu1 %839  ;;  %v911_v52 = vmul.f32 %v1903_v57, %v909_v44  ;;  %v977_v47 = vmul.f32 %v1815_v31, %v909_v44 }
 0xf1c   :  { %v842_v2 = vmul.f32 %v1860_v53, %v840_v13 }
 0xf1e   :  { %v843_v4 = vadd.f32 %v842_v2, %v837_v60 }
 0xf20   :  { %v846_v19 = vpop.permute.xlu1 %845 }
 0xf21   :  { %v848_v23 = vmul.f32 %v1872_v6, %v846_v19 }
 0xf23   :  { %v849_v28 = vadd.f32 %v848_v23, %v843_v4 }
 0xf25   :  { %v855_v30 = vadd.f32 %v854_v27, %v849_v28  ;;  %v897_v37 = vpop.permute.xlu1 %896 }
 0xf26   :  { %v899_v63 = vmul.f32 %v1890_v43, %v897_v37  ;;  %v973_v7 = vmul.f32 %v1803_v22, %v897_v37 }
 0xf27   :  { %v894_v41 = vadd.f32 %v893_v34, %v855_v30 }
 0xf29   :  { %v900_v48 = vadd.f32 %v899_v63, %v894_v41 }
 0xf2a   :  { %v903_v3 = vpop.permute.xlu1 %902 }
 0xf2b   :  { %v905_v54 = vmul.f32 %v1896_v51, %v903_v3  ;;  %v975_v12 = vmul.f32 %v1809_v40, %v903_v3 }
 0xf2d   :  { %v906_v59 = vadd.f32 %v905_v54, %v900_v48 }
 0xf2f   :  { %v912_v61 = vadd.f32 %v911_v52, %v906_v59  ;;  %v135_v0 = vpop.permute.xlu1 %134 }
 0xf30   :  { %v144_v24 = vmul.f32 %v135_v0, %v1439_v11 }
 0xf31   :  { %1334 = vtanh.f32 %v912_v61  ;;  %v1132_v11 = vmul.f32 -1.442695, %v912_v61 }
 0xf32   :  { %v152_v16 = vadd.f32 %v144_v24, %v100_v5 }
 0xf34   :  { %v972_v17 = vadd.f32 %v971_v9, %v152_v16 }
 0xf36   :  { %v974_v36 = vadd.f32 %v973_v7, %v972_v17 }
 0xf38   :  { %v976_v49 = vadd.f32 %v975_v12, %v974_v36 }
 0xf3a   :  { %v978_v20 = vadd.f32 %v977_v47, %v976_v49 }
 0xf3c   :  { %1336 = vtanh.f32 %v978_v20  ;;  %v1133_v25 = vmul.f32 -1.442695, %v978_v20 }
 0xf3d   :  { %1338 = vpow2.f32 %v1132_v11 }
 0xf3e   :  { %v1335_v21 = vpop.eup %1334  ;;  %1340 = vpow2.f32 %v1133_v25 }
 0xf3f   :  { %922 = vrot.lane.b32.xlu1 %v1335_v21, %s1396_s23 }
 0xf49   :  { %v1337_v56 = vpop.eup %1336 }
 0xf4a   :  { %988 = vrot.lane.b32.xlu1 %v1337_v56, %s1396_s23  ;;  %v1339_v22 = vpop.eup %1338 }
 0xf4b   :  { %v916_v1 = vadd.f32 1.0, %v1339_v22  ;;  %v1341_v40 = vpop.eup %1340 }
 0xf4c   :  { %v982_v13 = vadd.f32 1.0, %v1341_v40 }
 0xf4d   :  { %1342 = vrcp.f32 %v916_v1 }
 0xf4e   :  { %1344 = vrcp.f32 %v982_v13 }
 0xf5a   :  { %v1343_v31 = vpop.eup %1342 }
 0xf5b   :  { %v1345_v14 = vpop.eup %1344  ;;  %v920_v23 = vmul.f32 %v1343_v31, %v1823_v8 }
 0xf5c   :  { %v986_v29 = vmul.f32 %v1345_v14, %v1827_v38 }
 0xfb1   :  { %v923_v2 = vpop.permute.xlu1 %922 }
 0xfb2   :  { %v925_v60 = vmul.f32 %v1343_v31, %v923_v2 }
 0xfb4   :  { %927 = vrot.lane.b32.xlu0 %v925_v60, %s1397_s24 }
 0xfbc   :  { %v989_v19 = vpop.permute.xlu1 %988 }
 0xfbd   :  { %v991_v4 = vmul.f32 %v1345_v14, %v989_v19 }
 0xfbf   :  { %993 = vrot.lane.b32.xlu1 %v991_v4, %s1397_s24 }
0x1026   :  { %v928_v27 = vpop.permute.xlu0 %927 }
0x1027   :  { %v1917_v28 = vadd.f32 %v928_v27, %v920_v23 }
0x1029   :  { %1346 = vtanh.f32 %v1917_v28 }
0x1031   :  { %v994_v34 = vpop.permute.xlu1 %993 }
0x1032   :  { %v996_v30 = vadd.f32 %v994_v34, %v986_v29 }
0x1034   :  { %1348 = vtanh.f32 %v996_v30 }
0x1036   :  { %v1347_v37 = vpop.eup %1346 }
0x1037   :  { %933 = vrot.lane.b32.xlu0 %v1347_v37, %s1399_s25 }
0x1041   :  { %v1349_v41 = vpop.eup %1348 }
0x1042   :  { %999 = vrot.lane.b32.xlu1 %v1349_v41, %s1399_s25 }
0x10a9   :  { %v934_v63 = vpop.permute.xlu0 %933 }
0x10aa   :  { %v1923_v44 = vmul.f32 %v1343_v31, %v934_v63 }
0x10ac   :  { %954 = vperm.xlu1 %1222, %v1923_v44   ;;  %948 = vperm.xlu0 %1221, %v1923_v44  }
0x10b0   :  { %1223 = vset.pattern.permute.xlu1 %v1401_v45  ;;  %1226 = vset.pattern.permute.xlu0 %v1402_v46 }
0x10b1   :  { %960 = vperm.xlu1 %1223, %v1923_v44   ;;  %966 = vperm.xlu0 %1226, %v1923_v44  }
0x10b4   :  { %v1000_v8 = vpop.permute.xlu1 %999 }
0x10b5   :  { %v1002_v38 = vmul.f32 %v1345_v14, %v1000_v8  ;;  %1224 = vset.pattern.permute.xlu1 %v1398_v39  ;;  %1227 = vset.pattern.permute.xlu0 %v1401_v45 }
0x10b7   :  { %1005 = vperm.xlu1 %1224, %v1002_v38   ;;  %1017 = vperm.xlu0 %1227, %v1002_v38  }
0x10bb   :  { %1225 = vset.pattern.permute.xlu1 %v1400_v42  ;;  %1229 = vset.pattern.permute.xlu0 %v1402_v46 }
0x10bc   :  { %1011 = vperm.xlu1 %1225, %v1002_v38  }
0x10c0   :  { %1228 = vset.pattern.permute.xlu1 %v1402_v46 }
0x10c1   :  { %1023 = vperm.xlu1 %1228, %v1002_v38  }
0x1127   :  { %v955_v3 = vpop.permute.xlu1 %954  ;;  %v949_v48 = vpop.permute.xlu0 %948 }
0x1128   :  { %v951_v54 = vmul.f32 %v1854_v50, %v949_v48  ;;  %v957_v39 = vmul.f32 %v1860_v53, %v955_v3 }
0x112a   :  { %v952_v55 = vadd.f32 %v1866_v15, %v951_v54 }
0x112c   :  { %v961_v52 = vpop.permute.xlu1 %960  ;;  %v958_v45 = vadd.f32 %v957_v39, %v952_v55  ;;  %v967_v61 = vpop.permute.xlu0 %966  ;;  %v26_v55 = vld [vmem:[%s1984_s1 + $0x80] sm:$0xff] }
0x112d   :  { %v963_v59 = vmul.f32 %v1872_v6, %v961_v52  ;;  %v969_v5 = vmul.f32 %v1878_v26, %v967_v61  ;;  %v25_v26 = vld [vmem:[%s1984_s1 + $0x78] sm:$0xff]  ;;  %s1409_s1 = smov 6  }
0x112f   :  { %v964_v42 = vadd.f32 %v963_v59, %v958_v45 }
0x1131   :  { %v970_v24 = vadd.f32 %v969_v5, %v964_v42 }
0x1132   :  { %v1006_v0 = vpop.permute.xlu1 %1005  ;;  %v1018_v9 = vpop.permute.xlu0 %1017 }
0x1133   :  { %v1008_v46 = vmul.f32 %v1884_v32, %v1006_v0  ;;  %v1020_v15 = vmul.f32 %v1896_v51, %v1018_v9 }
0x1135   :  { %v1009_v7 = vadd.f32 %v1008_v46, %v970_v24 }
0x1137   :  { %v1012_v16 = vpop.permute.xlu1 %1011 }
0x1138   :  { %v1014_v50 = vmul.f32 %v1890_v43, %v1012_v16 }
0x113a   :  { %v1015_v53 = vadd.f32 %v1014_v50, %v1009_v7 }
0x113c   :  { %v1024_v17 = vpop.permute.xlu1 %1023  ;;  %v1021_v12 = vadd.f32 %v1020_v15, %v1015_v53 }
0x113d   :  { %v1026_v6 = vmul.f32 %v1903_v57, %v1024_v17 }
0x113f   :  { %v1027_v36 = vadd.f32 %v1026_v6, %v1021_v12 }
0x1141   :  { %1350 = vtanh.f32 %v1027_v36  ;;  %v1134_v32 = vmul.f32 -1.442695, %v1027_v36 }
0x1143   :  { %1352 = vpow2.f32 %v1134_v32 }
0x114e   :  { %v1351_v47 = vpop.eup %1350 }
0x114f   :  { %1037 = vrot.lane.b32.xlu1 %v1351_v47, %s1396_s23  ;;  %s1404_s23 = smov 116  }
0x1150   :  { %v1353_v43 = vpop.eup %1352 }
0x1151   :  { %v1031_v51 = vadd.f32 1.0, %v1353_v43 }
0x1153   :  { %243 = vrot.lane.b32.xlu1 %v25_v26, %s1403_s9  ;;  %1354 = vrcp.f32 %v1031_v51 }
0x1160   :  { %v1355_v49 = vpop.eup %1354 }
0x1161   :  { %v1035_v22 = vmul.f32 %v1355_v49, %v1917_v28 }
0x11c1   :  { %v1038_v20 = vpop.permute.xlu1 %1037 }
0x11c2   :  { %v1040_v21 = vmul.f32 %v1355_v49, %v1038_v20 }
0x11c4   :  { %1042 = vrot.lane.b32.xlu0 %v1040_v21, %s1397_s24 }
0x11c5   :  { %v244_v57 = vpop.permute.xlu1 %243 }
0x11c6   :  { %v246_v56 = vmul.f32 %v244_v57, %v1562_v10  ;;  %v362_v11 = vmul.f32 %v1611_v62, %v244_v57  ;;  %v477_v62 = vmul.f32 %v1660_v35, %v244_v57  ;;  %v592_v60 = vmul.f32 %v1709_v18, %v244_v57 }
0x11c7   :  { %v707_v29 = vmul.f32 %v1758_v58, %v244_v57  ;;  %v937_v18 = vmul.f32 %v1923_v44, %v244_v57  ;;  %v822_v37 = vmul.f32 %v1832_v33, %v244_v57 }
0x11c8   :  { %248 = vrot.lane.b32.xlu0 %v246_v56, %s1404_s23 }
0x11cc   :  { %364 = vrot.lane.b32.xlu0 %v362_v11, %s1404_s23 }
0x1236   :  { %v1043_v25 = vpop.permute.xlu0 %1042 }
0x1237   :  { %v1045_v40 = vadd.f32 %v1043_v25, %v1035_v22 }
0x1239   :  { %1356 = vtanh.f32 %v1045_v40 }
0x123a   :  { %v249_v1 = vpop.permute.xlu0 %248 }
0x123b   :  { %v252_v13 = vsel %vm251_vm0, %v249_v1, 0.0 }
0x123c   :  { %253 = vadd.xlane.f32.xlu1 %v252_v13 }
0x123e   :  { %v365_v31 = vpop.permute.xlu0 %364 }
0x123f   :  { %v367_v10 = vsel %vm251_vm0, %v365_v31, 0.0 }
0x1240   :  { %368 = vadd.xlane.f32.xlu0 %v367_v10 }
0x1246   :  { %v1357_v2 = vpop.eup %1356 }
0x124d   :  { %1048 = vrot.lane.b32.xlu1 %v1357_v2, %s1399_s25 }
0x1256   :  { %479 = vrot.lane.b32.xlu0 %v477_v62, %s1404_s23 }
0x125a   :  { %594 = vrot.lane.b32.xlu0 %v592_v60, %s1404_s23 }
0x12c5   :  { %v254_v28 = vpop.xlane.xlu1 %253 }
0x12c6   :  { %v255_v50 = vadd.f32 %v254_v28, %v26_v55 }
0x12c9   :  { %v369_v14 = vpop.xlane.xlu0 %368  ;;  %v1049_v34 = vpop.permute.xlu1 %1048 }
0x12ca   :  { %v1051_v35 = vmul.f32 %v1355_v49, %v1049_v34  ;;  %v370_v45 = vadd.f32 %v369_v14, %v26_v55 }
0x12cc   :  { %v1052_v30 = vmul.f32 %v1051_v35, %v244_v57 }
0x12cd   :  { %v480_v19 = vpop.permute.xlu0 %479 }
0x12ce   :  { %v482_v4 = vsel %vm251_vm0, %v480_v19, 0.0 }
0x12cf   :  { %483 = vadd.xlane.f32.xlu1 %v482_v4 }
0x12d1   :  { %v595_v23 = vpop.permute.xlu0 %594 }
0x12d2   :  { %v597_v27 = vsel %vm251_vm0, %v595_v23, 0.0 }
0x12d3   :  { %598 = vadd.xlane.f32.xlu0 %v597_v27 }
0x12e0   :  { %709 = vrot.lane.b32.xlu1 %v707_v29, %s1404_s23 }
0x12e4   :  { %939 = vrot.lane.b32.xlu1 %v937_v18, %s1404_s23 }
0x12e8   :  { %1054 = vrot.lane.b32.xlu1 %v1052_v30, %s1404_s23 }
0x12e9   :  { %824 = vrot.lane.b32.xlu0 %v822_v37, %s1404_s23 }
0x1358   :  { %v484_v41 = vpop.xlane.xlu1 %483 }
0x1359   :  { %v485_v39 = vadd.f32 %v484_v41, %v26_v55 }
0x135c   :  { %v599_v63 = vpop.xlane.xlu0 %598  ;;  %v710_v8 = vpop.permute.xlu1 %709 }
0x135d   :  { %v712_v58 = vsel %vm251_vm0, %v710_v8, 0.0  ;;  %v600_v52 = vadd.f32 %v599_v63, %v26_v55 }
0x135e   :  { %713 = vadd.xlane.f32.xlu1 %v712_v58 }
0x1360   :  { %v825_v38 = vpop.permute.xlu0 %824  ;;  %v940_v3 = vpop.permute.xlu1 %939 }
0x1361   :  { %v827_v48 = vsel %vm251_vm0, %v825_v38, 0.0  ;;  %v942_v54 = vsel %vm251_vm0, %v940_v3, 0.0 }
0x1362   :  { %828 = vadd.xlane.f32.xlu0 %v827_v48 }
0x1364   :  { %v1055_v44 = vpop.permute.xlu1 %1054 }
0x1365   :  { %v1057_v33 = vsel %vm251_vm0, %v1055_v44, 0.0 }
0x1366   :  { %943 = vadd.xlane.f32.xlu0 %v942_v54  ;;  %1058 = vadd.xlane.f32.xlu1 %v1057_v33 }
0x1377   :  { %1066 = vrot.lane.b32.xlu1 %v485_v39, %s1405_s11 }
0x137b   :  { %1070 = vrot.lane.b32.xlu1 %v600_v52, %s1406_s12 }
0x137c   :  { %1062 = vrot.lane.b32.xlu0 %v370_v45, %s1407_s13 }
0x13e7   :  { %v714_v59 = vpop.xlane.xlu1 %713 }
0x13e8   :  { %v715_v61 = vadd.f32 %v714_v59, %v26_v55 }
0x13ea   :  { %1074 = vrot.lane.b32.xlu0 %v715_v61, %s1397_s24  ;;  %s1411_s24 = smov [#allocation2]  }
0x13eb   :  { %v829_v42 = vpop.xlane.xlu0 %828  ;;  %s1110_s15 = sshll.u32 %s1411_s24, 4  ;;  %s1111_s15 = int_to_ptr.vmem [resolvable:$true] %s1110_s15 }
0x13ec   :  { %v830_v0 = vadd.f32 %v829_v42, %v26_v55  ;;  %s1372_s16 = scalar_lea.vmem %s1111_s15, 128  ;;  %p1377_p1 = scmp.lt.s32.totalorder %s1111_s15, %s1111_s15 }
0x13ed   :  { %p1373_p0 = scmp.ne.s32.totalorder %s1111_s15, %s1372_s16  ;;  %p1378_p2 = scmp.lt.s32.totalorder %s1372_s16, %s1372_s16 }
0x13ee   :  { %1078 = vrot.lane.b32.xlu1 %v830_v0, %s1408_s14 }
0x13ef   :  { %v944_v5 = vpop.xlane.xlu0 %943  ;;  %v1059_v46 = vpop.xlane.xlu1 %1058  ;;  %p1379_p3 = por %p1378_p2, %p1377_p1 }
0x13f0   :  { %v945_v24 = vadd.f32 %v944_v5, %v26_v55  ;;  %v1060_v9 = vadd.f32 %v1059_v46, %v26_v55 }
0x13f1   :  { %p1380_p4 = pnand %p1379_p3, %p1373_p0 }
0x13f2   :  { %1082 = vrot.lane.b32.xlu0 %v945_v24, %s1409_s1  ;;  %1086 = vrot.lane.b32.xlu1 %v1060_v9, %s1410_s0 }
0x13f3   :  { %v1067_v16 = vpop.permute.xlu1 %1066  ;;  %v1063_v7 = vpop.permute.xlu0 %1062 }
0x13f4   :  { %v1090_v53 = vsel %vm1089_vm1, %v255_v50, %v1063_v7 }
0x13f5   :  { %v1092_v6 = vsel %vm1091_vm2, %v1090_v53, %v1067_v16 }
0x13f7   :  { %v1071_v15 = vpop.permute.xlu1 %1070 }
0x13f8   :  { %v1094_v36 = vsel %vm1093_vm3, %v1092_v6, %v1071_v15 }
0x145c   :  { %v1075_v17 = vpop.permute.xlu0 %1074 }
0x145d   :  { %v1095_v47 = vsel %vm251_vm0, %v1094_v36, %v1075_v17 }
0x1460   :  { %v1079_v12 = vpop.permute.xlu1 %1078 }
0x1461   :  { %v1097_v26 = vsel %vm1096_vm4, %v1095_v47, %v1079_v12 }
0x1464   :  { %v1083_v32 = vpop.permute.xlu0 %1082  ;;  %v1087_v43 = vpop.permute.xlu1 %1086 }
0x1465   :  { %v1099_v51 = vsel %vm1098_vm5, %v1097_v26, %v1083_v32 }
0x1466   :  { %v1101_v49 = vsel %vm1100_vm6, %v1099_v51, %v1087_v43 }
0x1467   :  { %1103 = vst.msk [vmem:[#allocation2] sm:$0xff] %vm1102_vm7, %v1101_v49 }
0x1468   :  { %1383 = shalt.err (!%p1380_p4)
}
0x1469   :  { %1113 = dma.vmem_to_hbm [thread:$0]  %s1111_s15, 128, %s1985_s2, [#allocation3]  }
0x146a   :  { %1392 = dma.done.wait [#allocation3], 128  }
0x146b   :  { %1393 = vsyncadd [#allocation3], 4294967168 }
0x146c   :  { %1117 = vsyncpa [#allocation3], 1 }

</bundles_post_ra>
